<compile_context>
chip_gen: v5e
topology: v5e:2x2
jax: 0.10.0
libtpu: 0.0.40
codegen_flags: <defaults>
</compile_context>

<pallas_src>
import jax
import jax.numpy as jnp
from jax.experimental import pallas as pl
from jax.experimental.pallas import tpu as pltpu


# ----------------------------- in-kernel math --------------------------------

def _gelu(x):
    # tanh approximation of GELU.
    # TODO(synk): the source repo's `gelu` is the erf variant; swap to
    # x*0.5*(1+erf(x/sqrt(2))) if exact erf lowering is required (~1e-3 diff).
    c = 0.7978845608028654  # sqrt(2/pi)
    return 0.5 * x * (1.0 + jnp.tanh(c * (x + 0.044715 * x * x * x)))


def _layer_norm(h, gamma, beta, eps=1e-5):
    mu = jnp.mean(h, axis=-1, keepdims=True)
    var = jnp.mean((h - mu) ** 2, axis=-1, keepdims=True)
    return (h - mu) * jax.lax.rsqrt(var + eps) * gamma + beta


_TRANS_RHS = (((1,), (1,)), ((), ()))   # contract rhs dim 1  ->  lhs @ rhs.T


# --------------------------------- kernels ------------------------------------

def gcn_kernel(a_ref, x_ref, wdr_ref, w1_ref, g_ref, b_ref, w2_ref, out_ref):
    """G packed graphs per grid step: 2 GCN layers + predict MLP -> [1, G*N]."""
    H = wdr_ref.shape[0]
    mm_dt = wdr_ref.dtype                    # matmul weight dtype (f32 / bf16)
    At = a_ref[0].astype(mm_dt)              # [GN, GN] block-diag A^T (host-built)
    wdr = wdr_ref[...]                       # [H, 2H]  == [Wd.T | Wr.T]

    def layer(x_f32):
        # One fused MXU matmul for diffusion + retained (cast just before dot).
        y = jnp.dot(x_f32.astype(mm_dt), wdr,
                    preferred_element_type=jnp.float32)             # [GN, 2H]
        d = _gelu(y[:, :H])                                         # diffusion
        r = y[:, H:]                                                 # retained
        diff = jnp.dot(At, d.astype(mm_dt),
                       preferred_element_type=jnp.float32)          # A^T @ d
        return _gelu(r + diff)                                       # stays f32

    x = layer(layer(x_ref[0]))                                       # [GN, H] f32

    # predict MLP: Linear(H,H,bias=False) -> gelu -> LayerNorm -> Linear(H,1)
    h = _gelu(jnp.dot(x.astype(mm_dt), w1_ref[...],
                      preferred_element_type=jnp.float32))
    h = _layer_norm(h, g_ref[...].astype(jnp.float32),
                    b_ref[...].astype(jnp.float32))
    # Final projection written as a lane-dense [1, GN] row (unmasked store).
    out_ref[0] = jax.lax.dot_general(w2_ref[...], h.astype(mm_dt), _TRANS_RHS,
                                     preferred_element_type=jnp.float32)


def mlp_head_kernel(xi_ref, yi_ref, sem_ref, w1_ref, g_ref, b_ref, w2_ref,
                    out_ref):
    """Q query pairs: (semantics[x]-semantics[y]) via signed-one-hot matmul."""
    Q = xi_ref.shape[0]
    N = sem_ref.shape[0]
    mm_dt = w1_ref.dtype
    # Signed selector S[Q, N]: +1 at x_idx[q], -1 at y_idx[q]; built with a
    # broadcasted iota + vector compare (no serialized dynamic-index loads).
    node = jax.lax.broadcasted_iota(jnp.int32, (Q, N), 1)
    sel = ((node == xi_ref[...]).astype(jnp.float32)
           - (node == yi_ref[...]).astype(jnp.float32))             # [Q, N] f32
    diff = jnp.dot(sel, sem_ref[...],
                   preferred_element_type=jnp.float32)              # [Q, H] f32

    h = _gelu(jnp.dot(diff.astype(mm_dt), w1_ref[...],
                      preferred_element_type=jnp.float32))
    h = _layer_norm(h, g_ref[...].astype(jnp.float32),
                    b_ref[...].astype(jnp.float32))
    # Lane-dense [1, Q] output slab.
    out_ref[...] = jax.lax.dot_general(w2_ref[...], h.astype(mm_dt), _TRANS_RHS,
                                       preferred_element_type=jnp.float32)


# -------------------------------- wrappers -------------------------------------

def _choose_group(B, N, target_rows=128):
    """Largest divisor of B with G*N <= 128 rows, keeping >=2 grid steps."""
    per = max(1, target_rows // N)
    if B >= 2:
        per = min(per, B // 2)   # v7x has 2 TensorCores: keep >=2 parallel steps
    per = max(1, per)
    while B % per:
        per -= 1
    return per


def _pack_graphs(adj, sem, group):
    """[B,N,N],[B,N,H] -> block-diag A^T [B/G,GN,GN], packed sem [B/G,GN,H]."""
    B, N, _ = adj.shape
    H = sem.shape[-1]
    Bg = B // group
    adj_t = jnp.swapaxes(adj, -1, -2)                   # pre-transpose once (host)
    adj_g = adj_t.reshape(Bg, group, N, N)
    eye = jnp.eye(group, dtype=adj.dtype)
    a_bd = jnp.einsum("bgij,gh->bgihj", adj_g, eye).reshape(Bg, group * N,
                                                            group * N)
    sem_p = sem.reshape(Bg, group * N, H)
    return a_bd, sem_p


def gcn_forward(adj_b, sem_b, p, *, graphs_per_step=None,
                matmul_dtype=jnp.float32):
    """Batched GCN: adj_b [B,N,N], sem_b [B,N,H] -> logits [B, N].

    G graphs are packed per grid step (block-diagonal adjacency) so matmuls run
    at full sublane fill; grid axis is 'parallel'.  Only weights are cast to
    `matmul_dtype` (use bf16 for production H on v6e/v7x); activations stay f32.
    """
    B, N, _ = adj_b.shape
    H = sem_b.shape[-1]
    G = graphs_per_step or _choose_group(B, N)
    assert B % G == 0, "batch must be divisible by graphs_per_step"
    Bg, GN = B // G, G * N
    a_bd, sem_p = _pack_graphs(adj_b.astype(jnp.float32),
                               sem_b.astype(jnp.float32), G)
    mm = matmul_dtype
    const2 = lambda b: (0, 0)
    # TODO(synk): for production H, give the constant weight specs
    # pipeline_mode=pl.Buffered(1) to avoid double-buffering them in VMEM.
    out = pl.pallas_call(
        gcn_kernel,
        out_shape=jax.ShapeDtypeStruct((Bg, 1, GN), jnp.float32),
        grid_spec=pltpu.PrefetchScalarGridSpec(
            num_scalar_prefetch=0,
            grid=(Bg,),
            in_specs=[
                pl.BlockSpec((1, GN, GN), lambda b: (b, 0, 0)),  # block-diag A^T
                pl.BlockSpec((1, GN, H), lambda b: (b, 0, 0)),   # packed semantics
                pl.BlockSpec((H, 2 * H), const2),                # [Wd.T | Wr.T]
                pl.BlockSpec((H, H), const2),                    # predict W1.T
                pl.BlockSpec((1, H), const2),                    # LN gamma
                pl.BlockSpec((1, H), const2),                    # LN beta
                pl.BlockSpec((1, H), const2),                    # predict W2 row
            ],
            out_specs=pl.BlockSpec((1, 1, GN), lambda b: (b, 0, 0)),
        ),
        compiler_params=pltpu.CompilerParams(
            dimension_semantics=("parallel",),
            vmem_limit_bytes=32 * 1024 * 1024,
        ),
    )(a_bd, sem_p, p["wdr_t"].astype(mm), p["w1_t"].astype(mm),
      p["ln_g"], p["ln_b"], p["w2"].astype(mm))
    return out.reshape(B, N)


def mlp_head_forward(semantics, x_idx, y_idx, p, *, matmul_dtype=jnp.float32):
    """Q query pairs against one MLP head (both_net / select_net) -> logits [Q]."""
    N, H = semantics.shape
    Q = int(x_idx.shape[0])
    mm = matmul_dtype
    xi = x_idx.astype(jnp.int32).reshape(Q, 1)
    yi = y_idx.astype(jnp.int32).reshape(Q, 1)
    # TODO(synk): for production-scale N, gather only the 2Q needed rows
    # (pl.Element BlockSpec / manual DMA) instead of staging all of semantics.
    out = pl.pallas_call(
        mlp_head_kernel,
        out_shape=jax.ShapeDtypeStruct((1, Q), jnp.float32),
    )(xi, yi, semantics.astype(jnp.float32), p["w1_t"].astype(mm),
      p["ln_g"], p["ln_b"], p["w2"].astype(mm))
    return out[0]


def _bce_with_logits(z, y):
    return jnp.maximum(z, 0.0) - z * y + jnp.log1p(jnp.exp(-jnp.abs(z)))


def cognitive_gnn_forward(params, semantics, adj, question_type, answer_id):
    """Mirrors CognitiveGNN.forward's loss computation for a single bundle.

    `question_type` must be a static Python int (the reference branches on it).
    Returns (hop_loss, ans_loss, final_loss).
    """
    # TODO(synk): hop_loss / ans_loss come from the external BERT model(*batch)
    # (bundle_part_to_batch + additional-node re-encoding); not translatable.
    hop_loss = jnp.float32(0.0)
    ans_loss = jnp.float32(0.0)

    if question_type == 0:
        pred = gcn_forward(adj[None], semantics[None], params["gcn"])[0]   # [N]
        # CrossEntropyLoss(pred.unsqueeze(0), [answer_id])
        final_loss = jax.nn.logsumexp(pred) - pred[answer_id]
    else:
        x_idx, y_idx, ans = answer_id
        p = params["both_net"] if question_type == 1 else params["select_net"]
        z = mlp_head_forward(semantics,
                             jnp.array([x_idx], jnp.int32),
                             jnp.array([y_idx], jnp.int32), p)[0]
        final_loss = 0.2 * _bce_with_logits(z, jnp.float32(ans))
    return hop_loss, ans_loss, final_loss


# ----------------------------- pure-JAX references -----------------------------

def _gcn_ref(adj, sem, p):
    H = sem.shape[-1]
    def layer(x):
        y = x @ p["wdr_t"]
        return _gelu(y[:, H:] + adj.T @ _gelu(y[:, :H]))
    x = layer(layer(sem))
    h = _layer_norm(_gelu(x @ p["w1_t"]), p["ln_g"], p["ln_b"])
    return (h @ p["w2"].T)[:, 0]


def _head_ref(sem, xi, yi, p):
    diff = sem[xi] - sem[yi]
    h = _layer_norm(_gelu(diff @ p["w1_t"]), p["ln_g"], p["ln_b"])
    return (h @ p["w2"].T)[:, 0]


# ----------------------------- parameter init ----------------------------------

def _mlp_head_params(key, H, std=0.05):
    k1, k2 = jax.random.split(key)
    w1 = jax.random.normal(k1, (H, H), jnp.float32) * std   # torch layout [out,in]
    w2 = jax.random.normal(k2, (1, H), jnp.float32) * std   # torch layout [1, H]
    return {
        "w1_t": w1.T,                        # [in, out]
        "w2": w2,                            # kept as a [1, H] row
        "ln_g": jnp.ones((1, H), jnp.float32),
        "ln_b": jnp.zeros((1, H), jnp.float32),
    }


def init_params(key, hidden_size):
    kd, kr, kmlp, kboth, ksel = jax.random.split(key, 5)
    std = 0.05  # GCN.init_weights: normal(mean=0, std=0.05) on Linear weights
    H = hidden_size
    wd = jax.random.normal(kd, (H, H), jnp.float32) * std
    wr = jax.random.normal(kr, (H, H), jnp.float32) * std
    gcn = {"wdr_t": jnp.concatenate([wd.T, wr.T], axis=1)}   # [H, 2H]
    gcn.update(_mlp_head_params(kmlp, H, std))
    return {
        "gcn": gcn,
        "both_net": _mlp_head_params(kboth, H, std),
        "select_net": _mlp_head_params(ksel, H, std),
    }


# ----------------------------------- main ---------------------------------------

if __name__ == "__main__":
    key = jax.random.PRNGKey(0)
    k_sem, k_adj, k_par = jax.random.split(key, 3)

    hidden_size = 128   # H: lane-aligned (real model uses BERT hidden, e.g. 768)
    num_nodes = 8       # N: sublane-aligned
    num_graphs = 32     # B: packed 16-per-step -> grid=(2,) parallel steps
    num_queries = 3     # Q: batched into one launch

    sem_b = jax.random.normal(k_sem, (num_graphs, num_nodes, hidden_size),
                              jnp.float32)
    adj_b = jax.random.uniform(k_adj, (num_graphs, num_nodes, num_nodes),
                               jnp.float32)
    params = init_params(k_par, hidden_size)

    # Batched question_type == 0 path: 16 graphs packed per grid step.
    pred = gcn_forward(adj_b, sem_b, params["gcn"])                 # [B, N]
    answer_ids = (jnp.arange(num_graphs, dtype=jnp.int32) % num_nodes)
    ce_losses = (jax.nn.logsumexp(pred, axis=-1)
                 - jnp.take_along_axis(pred, answer_ids[:, None], axis=-1)[:, 0])

    # Batched question_type == 1 path: Q pairs in one launch, gather fused as a
    # signed one-hot selector matmul.
    x_idx = jnp.array([0, 2, 4], jnp.int32)
    y_idx = jnp.array([5, 1, 7], jnp.int32)
    ans = jnp.array([1.0, 0.0, 1.0], jnp.float32)
    z = mlp_head_forward(sem_b[0], x_idx, y_idx, params["both_net"])  # [Q]
    bce_losses = 0.2 * _bce_with_logits(z, ans)

    # Single-bundle API mirroring CognitiveGNN.forward (type 0 and type 2).
    hop0, ans0, loss_t0 = cognitive_gnn_forward(
        params, sem_b[0], adj_b[0], question_type=0, answer_id=3)
    hop2, ans2, loss_t2 = cognitive_gnn_forward(
        params, sem_b[0], adj_b[0], question_type=2, answer_id=(0, 5, 1.0))

    jax.block_until_ready((pred, ce_losses, z, bce_losses, loss_t0, loss_t2))

    # Lightweight correctness check against a pure-JAX reference (loose tol to
    # absorb MXU vs XLA matmul-precision differences).
    pred_ref = jax.vmap(_gcn_ref, in_axes=(0, 0, None))(adj_b, sem_b,
                                                        params["gcn"])
    z_ref = _head_ref(sem_b[0], x_idx, y_idx, params["both_net"])
    assert jnp.allclose(pred, pred_ref, atol=3e-2, rtol=3e-2), "GCN mismatch"
    assert jnp.allclose(z, z_ref, atol=3e-2, rtol=3e-2), "MLP head mismatch"

    print("KERNEL_OK")
</pallas_src>

<mosaic_0001>
module attributes {stable_mosaic.version = 11 : i64} {
  func.func @gcn_kernel(%arg0: i32, %arg1: memref<1x128x128xf32, #tpu.memory_space<vmem>>, %arg2: memref<1x128x128xf32, #tpu.memory_space<vmem>>, %arg3: memref<128x256xf32, #tpu.memory_space<vmem>>, %arg4: memref<128x128xf32, #tpu.memory_space<vmem>>, %arg5: memref<1x128xf32, #tpu.memory_space<vmem>>, %arg6: memref<1x128xf32, #tpu.memory_space<vmem>>, %arg7: memref<1x128xf32, #tpu.memory_space<vmem>>, %arg8: memref<1x1x128xf32, #tpu.memory_space<vmem>>) attributes {dimension_semantics = [#tpu.dimension_semantics<parallel>], iteration_bounds = array<i64: 2>, scalar_prefetch = 0 : i64, scratch_operands = 0 : i64, tpu.core_type = #tpu.core_type<tc>, window_params = [{transform_indices = @transform_0, window_bounds = array<i64: 1, 128, 128>}, {transform_indices = @transform_1, window_bounds = array<i64: 1, 128, 128>}, {pipeline_mode = #tpu.pipeline_mode<synchronous>, transform_indices = @transform_2, window_bounds = array<i64: 128, 256>}, {pipeline_mode = #tpu.pipeline_mode<synchronous>, transform_indices = @transform_3, window_bounds = array<i64: 128, 128>}, {pipeline_mode = #tpu.pipeline_mode<synchronous>, transform_indices = @transform_4, window_bounds = array<i64: 1, 128>}, {pipeline_mode = #tpu.pipeline_mode<synchronous>, transform_indices = @transform_5, window_bounds = array<i64: 1, 128>}, {pipeline_mode = #tpu.pipeline_mode<synchronous>, transform_indices = @transform_6, window_bounds = array<i64: 1, 128>}, {transform_indices = @transform_7, window_bounds = array<i64: 1, 1, 128>}]} {
    %c0 = arith.constant 0 : index
    %c0_0 = arith.constant 0 : index
    %c0_1 = arith.constant 0 : index
    %0 = vector.load %arg1[%c0, %c0_0, %c0_1] : memref<1x128x128xf32, #tpu.memory_space<vmem>>, vector<1x128x128xf32>
    %1 = vector.shape_cast %0 : vector<1x128x128xf32> to vector<128x128xf32>
    %c0_2 = arith.constant 0 : index
    %c0_3 = arith.constant 0 : index
    %2 = vector.load %arg3[%c0_2, %c0_3] : memref<128x256xf32, #tpu.memory_space<vmem>>, vector<128x256xf32>
    %c0_4 = arith.constant 0 : index
    %c0_5 = arith.constant 0 : index
    %c0_6 = arith.constant 0 : index
    %3 = vector.load %arg2[%c0_4, %c0_5, %c0_6] : memref<1x128x128xf32, #tpu.memory_space<vmem>>, vector<1x128x128xf32>
    %4 = vector.shape_cast %3 : vector<1x128x128xf32> to vector<128x128xf32>
    %cst = arith.constant dense<0.000000e+00> : vector<128x256xf32>
    %5 = tpu.matmul %4, %2, %cst {dimension_numbers = #tpu.dot_dimension_numbers<[1], [0], [0], [1], [0, 0, 1, 1], [], []>} : vector<128x128xf32>, vector<128x256xf32>, vector<128x256xf32> -> vector<128x256xf32>
    %6 = vector.extract_strided_slice %5 {offsets = [0, 0], sizes = [128, 128], strides = [1, 1]} : vector<128x256xf32> to vector<128x128xf32>
    %cst_7 = arith.constant 5.000000e-01 : f32
    %7 = vector.broadcast %cst_7 : f32 to vector<128x128xf32>
    %8 = arith.mulf %7, %6 : vector<128x128xf32>
    %cst_8 = arith.constant 4.471500e-02 : f32
    %9 = vector.broadcast %cst_8 : f32 to vector<128x128xf32>
    %10 = arith.mulf %9, %6 : vector<128x128xf32>
    %11 = arith.mulf %10, %6 : vector<128x128xf32>
    %12 = arith.mulf %11, %6 : vector<128x128xf32>
    %13 = arith.addf %6, %12 : vector<128x128xf32>
    %cst_9 = arith.constant 0.797884583 : f32
    %14 = vector.broadcast %cst_9 : f32 to vector<128x128xf32>
    %15 = arith.mulf %14, %13 : vector<128x128xf32>
    %16 = math.tanh %15 : vector<128x128xf32>
    %cst_10 = arith.constant 1.000000e+00 : f32
    %17 = vector.broadcast %cst_10 : f32 to vector<128x128xf32>
    %18 = arith.addf %17, %16 : vector<128x128xf32>
    %19 = arith.mulf %8, %18 : vector<128x128xf32>
    %20 = vector.extract_strided_slice %5 {offsets = [0, 128], sizes = [128, 128], strides = [1, 1]} : vector<128x256xf32> to vector<128x128xf32>
    %cst_11 = arith.constant dense<0.000000e+00> : vector<128x128xf32>
    %21 = tpu.matmul %1, %19, %cst_11 {dimension_numbers = #tpu.dot_dimension_numbers<[1], [0], [0], [1], [0, 0, 1, 1], [], []>} : vector<128x128xf32>, vector<128x128xf32>, vector<128x128xf32> -> vector<128x128xf32>
    %22 = arith.addf %20, %21 : vector<128x128xf32>
    %cst_12 = arith.constant 5.000000e-01 : f32
    %23 = vector.broadcast %cst_12 : f32 to vector<128x128xf32>
    %24 = arith.mulf %23, %22 : vector<128x128xf32>
    %cst_13 = arith.constant 4.471500e-02 : f32
    %25 = vector.broadcast %cst_13 : f32 to vector<128x128xf32>
    %26 = arith.mulf %25, %22 : vector<128x128xf32>
    %27 = arith.mulf %26, %22 : vector<128x128xf32>
    %28 = arith.mulf %27, %22 : vector<128x128xf32>
    %29 = arith.addf %22, %28 : vector<128x128xf32>
    %cst_14 = arith.constant 0.797884583 : f32
    %30 = vector.broadcast %cst_14 : f32 to vector<128x128xf32>
    %31 = arith.mulf %30, %29 : vector<128x128xf32>
    %32 = math.tanh %31 : vector<128x128xf32>
    %cst_15 = arith.constant 1.000000e+00 : f32
    %33 = vector.broadcast %cst_15 : f32 to vector<128x128xf32>
    %34 = arith.addf %33, %32 : vector<128x128xf32>
    %35 = arith.mulf %24, %34 : vector<128x128xf32>
    %cst_16 = arith.constant dense<0.000000e+00> : vector<128x256xf32>
    %36 = tpu.matmul %35, %2, %cst_16 {dimension_numbers = #tpu.dot_dimension_numbers<[1], [0], [0], [1], [0, 0, 1, 1], [], []>} : vector<128x128xf32>, vector<128x256xf32>, vector<128x256xf32> -> vector<128x256xf32>
    %37 = vector.extract_strided_slice %36 {offsets = [0, 0], sizes = [128, 128], strides = [1, 1]} : vector<128x256xf32> to vector<128x128xf32>
    %cst_17 = arith.constant 5.000000e-01 : f32
    %38 = vector.broadcast %cst_17 : f32 to vector<128x128xf32>
    %39 = arith.mulf %38, %37 : vector<128x128xf32>
    %cst_18 = arith.constant 4.471500e-02 : f32
    %40 = vector.broadcast %cst_18 : f32 to vector<128x128xf32>
    %41 = arith.mulf %40, %37 : vector<128x128xf32>
    %42 = arith.mulf %41, %37 : vector<128x128xf32>
    %43 = arith.mulf %42, %37 : vector<128x128xf32>
    %44 = arith.addf %37, %43 : vector<128x128xf32>
    %cst_19 = arith.constant 0.797884583 : f32
    %45 = vector.broadcast %cst_19 : f32 to vector<128x128xf32>
    %46 = arith.mulf %45, %44 : vector<128x128xf32>
    %47 = math.tanh %46 : vector<128x128xf32>
    %cst_20 = arith.constant 1.000000e+00 : f32
    %48 = vector.broadcast %cst_20 : f32 to vector<128x128xf32>
    %49 = arith.addf %48, %47 : vector<128x128xf32>
    %50 = arith.mulf %39, %49 : vector<128x128xf32>
    %51 = vector.extract_strided_slice %36 {offsets = [0, 128], sizes = [128, 128], strides = [1, 1]} : vector<128x256xf32> to vector<128x128xf32>
    %cst_21 = arith.constant dense<0.000000e+00> : vector<128x128xf32>
    %52 = tpu.matmul %1, %50, %cst_21 {dimension_numbers = #tpu.dot_dimension_numbers<[1], [0], [0], [1], [0, 0, 1, 1], [], []>} : vector<128x128xf32>, vector<128x128xf32>, vector<128x128xf32> -> vector<128x128xf32>
    %53 = arith.addf %51, %52 : vector<128x128xf32>
    %cst_22 = arith.constant 5.000000e-01 : f32
    %54 = vector.broadcast %cst_22 : f32 to vector<128x128xf32>
    %55 = arith.mulf %54, %53 : vector<128x128xf32>
    %cst_23 = arith.constant 4.471500e-02 : f32
    %56 = vector.broadcast %cst_23 : f32 to vector<128x128xf32>
    %57 = arith.mulf %56, %53 : vector<128x128xf32>
    %58 = arith.mulf %57, %53 : vector<128x128xf32>
    %59 = arith.mulf %58, %53 : vector<128x128xf32>
    %60 = arith.addf %53, %59 : vector<128x128xf32>
    %cst_24 = arith.constant 0.797884583 : f32
    %61 = vector.broadcast %cst_24 : f32 to vector<128x128xf32>
    %62 = arith.mulf %61, %60 : vector<128x128xf32>
    %63 = math.tanh %62 : vector<128x128xf32>
    %cst_25 = arith.constant 1.000000e+00 : f32
    %64 = vector.broadcast %cst_25 : f32 to vector<128x128xf32>
    %65 = arith.addf %64, %63 : vector<128x128xf32>
    %66 = arith.mulf %55, %65 : vector<128x128xf32>
    %c0_26 = arith.constant 0 : index
    %c0_27 = arith.constant 0 : index
    %67 = vector.load %arg4[%c0_26, %c0_27] : memref<128x128xf32, #tpu.memory_space<vmem>>, vector<128x128xf32>
    %cst_28 = arith.constant dense<0.000000e+00> : vector<128x128xf32>
    %68 = tpu.matmul %66, %67, %cst_28 {dimension_numbers = #tpu.dot_dimension_numbers<[1], [0], [0], [1], [0, 0, 1, 1], [], []>} : vector<128x128xf32>, vector<128x128xf32>, vector<128x128xf32> -> vector<128x128xf32>
    %cst_29 = arith.constant 5.000000e-01 : f32
    %69 = vector.broadcast %cst_29 : f32 to vector<128x128xf32>
    %70 = arith.mulf %69, %68 : vector<128x128xf32>
    %cst_30 = arith.constant 4.471500e-02 : f32
    %71 = vector.broadcast %cst_30 : f32 to vector<128x128xf32>
    %72 = arith.mulf %71, %68 : vector<128x128xf32>
    %73 = arith.mulf %72, %68 : vector<128x128xf32>
    %74 = arith.mulf %73, %68 : vector<128x128xf32>
    %75 = arith.addf %68, %74 : vector<128x128xf32>
    %cst_31 = arith.constant 0.797884583 : f32
    %76 = vector.broadcast %cst_31 : f32 to vector<128x128xf32>
    %77 = arith.mulf %76, %75 : vector<128x128xf32>
    %78 = math.tanh %77 : vector<128x128xf32>
    %cst_32 = arith.constant 1.000000e+00 : f32
    %79 = vector.broadcast %cst_32 : f32 to vector<128x128xf32>
    %80 = arith.addf %79, %78 : vector<128x128xf32>
    %81 = arith.mulf %70, %80 : vector<128x128xf32>
    %c0_33 = arith.constant 0 : index
    %c0_34 = arith.constant 0 : index
    %82 = vector.load %arg5[%c0_33, %c0_34] : memref<1x128xf32, #tpu.memory_space<vmem>>, vector<1x128xf32>
    %c0_35 = arith.constant 0 : index
    %c0_36 = arith.constant 0 : index
    %83 = vector.load %arg6[%c0_35, %c0_36] : memref<1x128xf32, #tpu.memory_space<vmem>>, vector<1x128xf32>
    %cst_37 = arith.constant dense<0.000000e+00> : vector<128xf32>
    %84 = vector.multi_reduction <add>, %81, %cst_37 [1] : vector<128x128xf32> to vector<128xf32>
    %85 = vector.shape_cast %84 : vector<128xf32> to vector<128x1xf32>
    %cst_38 = arith.constant 1.280000e+02 : f32
    %86 = vector.broadcast %cst_38 : f32 to vector<128x1xf32>
    %87 = arith.divf %85, %86 : vector<128x1xf32>
    %88 = vector.broadcast %87 : vector<128x1xf32> to vector<128x128xf32>
    %89 = arith.subf %81, %88 : vector<128x128xf32>
    %90 = arith.mulf %89, %89 : vector<128x128xf32>
    %cst_39 = arith.constant dense<0.000000e+00> : vector<128xf32>
    %91 = vector.multi_reduction <add>, %90, %cst_39 [1] : vector<128x128xf32> to vector<128xf32>
    %92 = vector.shape_cast %91 : vector<128xf32> to vector<128x1xf32>
    %cst_40 = arith.constant 1.280000e+02 : f32
    %93 = vector.broadcast %cst_40 : f32 to vector<128x1xf32>
    %94 = arith.divf %92, %93 : vector<128x1xf32>
    %95 = vector.broadcast %87 : vector<128x1xf32> to vector<128x128xf32>
    %96 = arith.subf %81, %95 : vector<128x128xf32>
    %cst_41 = arith.constant 9.99999974E-6 : f32
    %97 = vector.broadcast %cst_41 : f32 to vector<128x1xf32>
    %98 = arith.addf %94, %97 : vector<128x1xf32>
    %99 = math.rsqrt %98 : vector<128x1xf32>
    %100 = vector.broadcast %99 : vector<128x1xf32> to vector<128x128xf32>
    %101 = arith.mulf %96, %100 : vector<128x128xf32>
    %102 = vector.broadcast %82 : vector<1x128xf32> to vector<128x128xf32>
    %103 = arith.mulf %101, %102 : vector<128x128xf32>
    %104 = vector.broadcast %83 : vector<1x128xf32> to vector<128x128xf32>
    %105 = arith.addf %103, %104 : vector<128x128xf32>
    %c0_42 = arith.constant 0 : index
    %c0_43 = arith.constant 0 : index
    %106 = vector.load %arg7[%c0_42, %c0_43] : memref<1x128xf32, #tpu.memory_space<vmem>>, vector<1x128xf32>
    %cst_44 = arith.constant dense<0.000000e+00> : vector<1x128xf32>
    %107 = tpu.matmul %106, %105, %cst_44 {dimension_numbers = #tpu.dot_dimension_numbers<[1], [1], [0], [0], [0, 0, 1, 0], [], []>} : vector<1x128xf32>, vector<128x128xf32>, vector<1x128xf32> -> vector<1x128xf32>
    %c0_45 = arith.constant 0 : index
    %c0_46 = arith.constant 0 : index
    %c0_47 = arith.constant 0 : index
    %108 = vector.load %arg8[%c0_45, %c0_46, %c0_47] : memref<1x1x128xf32, #tpu.memory_space<vmem>>, vector<1x1x128xf32>
    %109 = vector.shape_cast %108 : vector<1x1x128xf32> to vector<1x128xf32>
    %110 = vector.shape_cast %107 : vector<1x128xf32> to vector<1x1x128xf32>
    tpu.vector_store %arg8[%c0_45, %c0_46, %c0_47], %110 {strides = array<i32>} : memref<1x1x128xf32, #tpu.memory_space<vmem>>, vector<1x1x128xf32>,
    return
  }
  func.func @transform_0(%arg0: i32) -> (i32, i32, i32) {
    %c0_i32 = arith.constant 0 : i32
    %c0_i32_0 = arith.constant 0 : i32
    %c0_i32_1 = arith.constant 0 : i32
    return %arg0, %c0_i32, %c0_i32_0 : i32, i32, i32
  }
  func.func @transform_1(%arg0: i32) -> (i32, i32, i32) {
    %c0_i32 = arith.constant 0 : i32
    %c0_i32_0 = arith.constant 0 : i32
    %c0_i32_1 = arith.constant 0 : i32
    return %arg0, %c0_i32, %c0_i32_0 : i32, i32, i32
  }
  func.func @transform_2(%arg0: i32) -> (i32, i32) {
    %c0_i32 = arith.constant 0 : i32
    %c0_i32_0 = arith.constant 0 : i32
    %c0_i32_1 = arith.constant 0 : i32
    return %c0_i32, %c0_i32_0 : i32, i32
  }
  func.func @transform_3(%arg0: i32) -> (i32, i32) {
    %c0_i32 = arith.constant 0 : i32
    %c0_i32_0 = arith.constant 0 : i32
    %c0_i32_1 = arith.constant 0 : i32
    return %c0_i32, %c0_i32_0 : i32, i32
  }
  func.func @transform_4(%arg0: i32) -> (i32, i32) {
    %c0_i32 = arith.constant 0 : i32
    %c0_i32_0 = arith.constant 0 : i32
    %c0_i32_1 = arith.constant 0 : i32
    return %c0_i32, %c0_i32_0 : i32, i32
  }
  func.func @transform_5(%arg0: i32) -> (i32, i32) {
    %c0_i32 = arith.constant 0 : i32
    %c0_i32_0 = arith.constant 0 : i32
    %c0_i32_1 = arith.constant 0 : i32
    return %c0_i32, %c0_i32_0 : i32, i32
  }
  func.func @transform_6(%arg0: i32) -> (i32, i32) {
    %c0_i32 = arith.constant 0 : i32
    %c0_i32_0 = arith.constant 0 : i32
    %c0_i32_1 = arith.constant 0 : i32
    return %c0_i32, %c0_i32_0 : i32, i32
  }
  func.func @transform_7(%arg0: i32) -> (i32, i32, i32) {
    %c0_i32 = arith.constant 0 : i32
    %c0_i32_0 = arith.constant 0 : i32
    %c0_i32_1 = arith.constant 0 : i32
    return %arg0, %c0_i32, %c0_i32_0 : i32, i32, i32
  }
}

</mosaic_0001>

<bundles_post_ra>
// kernel: tpu_custom_call.1
= control target key start
LH: loop header
LB: loop body
LE: loop exit
PB: predicated region body
PF: predicated region fallthrough
CT: control target
= control target key end

     0   :  { %s3766_s0 = inlined_call_operand.hbm [shape: f32[2,128,128], index: 0, kind: input, shape index: {}]   ;;  %s3767_s1 = inlined_call_operand.hbm [shape: f32[2,128,128], index: 1, kind: input, shape index: {}]   ;;  %s3768_s2 = inlined_call_operand.hbm [shape: f32[128,256], index: 2, kind: input, shape index: {}]   ;;  %s3769_s3 = inlined_call_operand.hbm [shape: f32[128,128], index: 3, kind: input, shape index: {}]   ;;  %s3770_s4 = inlined_call_operand.vmem [shape: f32[1,128], index: 4, kind: input, shape index: {}]   ;;  %s3771_s5 = inlined_call_operand.vmem [shape: f32[1,128], index: 5, kind: input, shape index: {}]   ;;  %s3772_s6 = inlined_call_operand.vmem [shape: f32[1,128], index: 6, kind: input, shape index: {}]   ;;  %s3773_s7 = inlined_call_operand.hbm [shape: f32[2,1,128], index: 7, kind: output, shape index: {}]  }
   0x1   :  { %3781 = sst [smem:[#allocation19_spill]] %s3766_s0 }
   0x2   :  { %3782 = sst [smem:[#allocation20_spill]] %s3768_s2 }
   0x3   :  { %3783 = sst [smem:[#allocation21_spill]] %s3769_s3 }
   0x4   :  { %12 = vsyncpa [#allocation3], 0 }
   0x5   :  { %14 = vsyncpa [#allocation3 + $0x1], 0 }
   0x6   :  { %15 = vsyncpa [#allocation6], 0 }
   0x7   :  { %17 = vsyncpa [#allocation6 + $0x1], 0 }
   0x8   :  { %18 = vsyncpa [#allocation9], 0 }
   0x9   :  { %19 = vsyncpa [#allocation4], 0 }
   0xa   :  { %21 = vsyncpa [#allocation4 + $0x1], 0  ;;  %s2758_s24 = smov 0   ;;  %s2760_s25 = smov 0  }
   0xb   :  { %s2762_s26 = smov 0   ;;  %s2764_s27 = smov 0  }
   0xc LB: > { %3784 = sst [smem:[#allocation16_spill]] %s2705_s26  ;;  %s2779_s28 = sadd.s32 4294967295, %s2709_s27   ;;  %s2709_s27 = sphi %s2764_s27, %s3802_s27   ;;  %s2705_s26 = sphi %s2762_s26, %s3804_s26   ;;  %s2701_s25 = sphi %s2760_s25, %s3806_s25   ;;  %s2697_s24 = sphi %s2758_s24, %s3805_s24  }
   0xd   : > { %s2170_s29 = sadd.s32 4294967294, %s2709_s27   ;;  %p47_p0 = scmp.ne.s32.totalorder %s2701_s25, %s2697_s24 }
   0xe   : > { %p48_p1 = scmp.eq.s32.totalorder %s2779_s28, 0  ;;  %p202_p2 = scmp.eq.s32.totalorder %s2779_s28, 1 }
   0xf   : > { %p208_p3 = scmp.eq.s32.totalorder %s2170_s29, 1  ;;  %p2171_p5 = scmp.ge.s32.totalorder %s2709_s27, 1 }
  0x10   : > { %p2788_p4 = por %p48_p1, %p47_p0  ;;  %p215_p7 = scmp.lt.s32.totalorder %s2709_s27, 3 }
  0x11   : > { %p2793_p6 = por %p208_p3, %p47_p0  ;;  %s3787_s2 = sld [smem:[#allocation20_spill]] }
  0x12   : > { %p2801_p8 = pnand %p2171_p5, %p215_p7  ;;  %s2711_s13 = smov [#allocation7]  }
  0x13   : > { %s228_s14 = sshll.u32 %s2711_s13, 4  ;;  %s3789_s3 = sld [smem:[#allocation21_spill]]  ;;  %s229_s14 = int_to_ptr.vmem [resolvable:$true] %s228_s14 }
  0x14   : > { %p2252_p9 = pneg %p2801_p8  ;;  %s2712_s18 = smov 256  }
  0x15   : > { %s2713_s19 = smov 16   ;;  %s2714_s20 = smov [#allocation8]  }
  0x16   : > { %p2253_p10 = pnand %p2252_p9, %p48_p1  ;;  %s242_s21 = sshll.u32 %s2714_s20, 4  ;;  %s243_s21 = int_to_ptr.vmem [resolvable:$true] %s242_s21 }
  0x17   : > { %s226_s11 = sshll.u32 %s3787_s2, 4  ;;  %s3774_s22 = smov 128   ;;  %s227_s11 = int_to_ptr.hbm [resolvable:$true] %s226_s11 }
  0x18   : > { %2255 = dma.hbm_to_vmem [thread:$0]  (!%p2253_p10), %s227_s11, 4096, %s229_s14, [#allocation6], %s2712_s18, %s2712_s18, %s2713_s19  }
  0x19   : > { %s240_s17 = sshll.u32 %s3789_s3, 4  ;;  %s3776_s23 = smov 8   ;;  %s241_s17 = int_to_ptr.hbm [resolvable:$true] %s240_s17 }
  0x1a   : > { %2258 = dma.hbm_to_vmem [thread:$0]  (!%p2253_p10), %s241_s17, 2048, %s243_s21, [#allocation9], %s3774_s22, %s3774_s22, %s3776_s23  }
  0x1b   : > { %s2817_s29 = sadd.s32 1, %s2709_s27   ;;  %s34_s10 = sadd.s32 1, %s2705_s26 }
  0x1c   : > { %3790 = sst [smem:[#allocation17_spill]] %s2817_s29  ;;  %s31_s9 = ssub.s32 %s2709_s27, %s2817_s29 }
  0x1d   : > { %p32_p12 = scmp.eq.s32.totalorder %s31_s9, 0  ;;  %p41_p13 = scmp.ne.s32.totalorder %s2705_s26, %s2701_s25 }
  0x1e   : > { %p42_p0 = scmp.eq.s32.totalorder %s2709_s27, 0  ;;  %p2272_p7 = scmp.lt.s32.totalorder %s2709_s27, 2 }
  0x1f   : > { %s2826_s11 = scalar_select %p32_p12, %s2705_s26, %s34_s10  }
  0x20   : > { %p43_p3 = por %p42_p0, %p41_p13  ;;  %p2830_p5 = por %p202_p2, %p41_p13 }
  0x21   : > { %3791 = sst [smem:[#allocation18_spill]] %s2826_s11  ;;  %s265_s14 = sand.u32 1, %s2705_s26  }
  0x22   : > { %s2836_s15 = sshll.u32 %s265_s14, 7  ;;  %s2188_s16 = sshll.u32 %s2709_s27, 7 }
  0x23   : > { %s3793_s0 = sld [smem:[#allocation19_spill]]  ;;  %s269_s20 = scalar_lea.vmem [#allocation2], %s2836_s15 }
  0x24   : > { %s277_s21 = sshll.u32 %s269_s20, 4  ;;  %p2843_p9 = pnand %p2272_p7, %p43_p3  ;;  %s278_s21 = int_to_ptr.vmem [resolvable:$true] %s277_s21 }
  0x25   : > { %s296_s2 = scalar_lea.hbm %s3767_s1, %s2188_s16  ;;  %s266_s11 = scalar_lea.sflag [#allocation3], %s265_s14 }
  0x26   : > { %s297_s3 = sshll.u32 %s296_s2, 4  ;;  %p2575_p10 = pneg %p2843_p9  ;;  %s298_s3 = int_to_ptr.hbm [resolvable:$true] %s297_s3 }
  0x29   : > { %s274_s19 = scalar_lea.hbm %s3793_s0, %s2188_s16  ;;  %s2578_s20 = scalar_lea.hbm %s3793_s0, 256 }
  0x2a   : > { %s275_s9 = sshll.u32 %s274_s19, 4  ;;  %s276_s9 = int_to_ptr.hbm [resolvable:$true] %s275_s9 }
  0x2b   : > { %s2571_s26 = sshra.s32 %s276_s9, 4  ;;  %s2572_s26 = int_to_ptr.hbm [resolvable:$true] %s2571_s26 }
  0x2c   : > { %s2573_s17 = scalar_lea.hbm %s2572_s26, 128  ;;  %p2579_p0 = scmp.lt.s32.totalorder %s2572_s26, %s3793_s0 }
  0x2d   : > { %p2574_p2 = scmp.ne.s32.totalorder %s2572_s26, %s2573_s17  ;;  %p2580_p3 = scmp.lt.s32.totalorder %s2578_s20, %s2573_s17 }
  0x2f   : > { %p2576_p12 = pnand %p2575_p10, %p2574_p2  ;;  %p2581_p7 = por %p2580_p3, %p2579_p0 }
  0x31   : > { %p2577_p13 = pneg %p2576_p12 }
  0x33   : > { %p2582_p11 = pnand %p2581_p7, %p2577_p13 }
  0x35   : > { %2585 = shalt.err (!%p2582_p11)
}
  0x36   : > { %s3795_s2 = smov 8   ;;  %s3796_s14 = smov 128  }
  0x37   : > { %2262 = dma.hbm_to_vmem [thread:$0]  (!%p2843_p9), %s276_s9, 2048, %s278_s21, %s266_s11, %s3796_s14, %s3796_s14, %s3795_s2  }
  0x38   : > { %s291_s16 = scalar_lea.vmem [#allocation5], %s2836_s15  ;;  %s287_s19 = sand.u32 1, %s2709_s27  }
  0x39   : > { %s299_s18 = sshll.u32 %s291_s16, 4  ;;  %s288_s22 = scalar_lea.sflag [#allocation6], %s287_s19  ;;  %s300_s18 = int_to_ptr.vmem [resolvable:$true] %s299_s18 }
  0x3a   : > { %s2601_s26 = sshra.s32 %s298_s3, 4  ;;  %s2608_s0 = scalar_lea.hbm %s3767_s1, 256  ;;  %s2602_s26 = int_to_ptr.hbm [resolvable:$true] %s2601_s26 }
  0x3b   : > { %s2603_s17 = scalar_lea.hbm %s2602_s26, 128  ;;  %p2609_p13 = scmp.lt.s32.totalorder %s2602_s26, %s3767_s1 }
  0x3c   : > { %p2604_p2 = scmp.ne.s32.totalorder %s2602_s26, %s2603_s17  ;;  %p2610_p0 = scmp.lt.s32.totalorder %s2608_s0, %s2603_s17 }
  0x3e   : > { %p2606_p11 = pnand %p2604_p2, %p2575_p10  ;;  %p2611_p3 = por %p2610_p0, %p2609_p13 }
  0x40   : > { %p2607_p12 = pneg %p2606_p11 }
  0x42   : > { %p2612_p7 = pnand %p2611_p3, %p2607_p12 }
  0x44   : > { %2615 = shalt.err (!%p2612_p7)
}
  0x45   : > { %2265 = dma.hbm_to_vmem [thread:$0]  (!%p2843_p9), %s298_s3, 2048, %s300_s18, %s288_s22, %s3796_s14, %s3796_s14, %s3795_s2  }
  0x46   : > { %311 = sbr.rel (%p2801_p8) target bundleno = 1791 (0x6ff), region = 48  ;;  %s2885_s15 = sand.u32 (!%p2801_p8), 1, %s2701_s25  }
  0x47   : > { %s2182_s29 = sshll.u32 (!%p2801_p8), %s2885_s15, 7  ;;  %s314_s0 = scalar_lea.sflag (!%p2801_p8), [#allocation3], %s2885_s15 }
  0x48   : > { %s2889_s21 = scalar_lea.vmem (!%p2801_p8), [#allocation2], %s2182_s29 }
  0x4b   : > { %2676 = dma.done.wait (%p2788_p4), %s314_s0, 2048  }
  0x4c   : > { %2678 = vsyncadd (%p2788_p4), %s314_s0, 4294965248  ;;  %s323_s3 = sand.u32 1, %s2779_s28   ;;  %s2896_s9 = scalar_lea.vmem [#allocation5], %s2182_s29 }
  0x4d   : > { %s324_s12 = scalar_lea.sflag [#allocation6], %s323_s3 }
  0x4e   : > { %2680 = dma.done.wait (%p2788_p4), %s324_s12, 2048  }
  0x4f   : > { %2682 = vsyncadd (%p2788_p4), %s324_s12, 4294965248 }
  0x50   : > { %2684 = dma.done.wait (%p48_p1), [#allocation6], 4096  }
  0x51   : > { %2686 = vsyncadd (%p48_p1), [#allocation6], 4294963200 }
  0x52   : > { %2688 = dma.done.wait (%p48_p1), [#allocation9], 2048  }
  0x53   : > { %2690 = vsyncadd (%p48_p1), [#allocation9], 4294965248  ;;  %v419_v0 = vld [vmem:[#allocation7 + $0xf0] sm:$0xff]  ;;  %v417_v1 = vld [vmem:[#allocation7 + $0xe0] sm:$0xff]  ;;  %s2058_s26 = scalar_lea.hbm %s3773_s7, %s2779_s28  ;;  %s372_s17 = scalar_lea.vmem [#allocation10], %s2885_s15 }
  0x54   : > { %2190 = vmatpush.msra.mxu3 %v419_v0  ;;  %437 = vmatpush.msra.mxu0 %v419_v0  ;;  %v415_v2 = vld [vmem:[#allocation7 + $0xd0] sm:$0xff]  ;;  %v413_v3 = vld [vmem:[#allocation7 + $0xc0] sm:$0xff]  ;;  %v2915_v17 = vld [vmem:[%s2896_s9 + $0x28] sm:$0xff]  ;;  %s2060_s20 = sshll.u32 %s372_s17, 4  ;;  %s2062_s23 = sshll.u32 %s2058_s26, 4  ;;  %s2061_s20 = int_to_ptr.vmem [resolvable:$true] %s2060_s20  ;;  %s2063_s23 = int_to_ptr.hbm [resolvable:$true] %s2062_s23 }
  0x55   : > { %v411_v4 = vld [vmem:[#allocation7 + $0xb0] sm:$0xff]  ;;  %v409_v5 = vld [vmem:[#allocation7 + $0xa0] sm:$0xff]  ;;  %v2923_v19 = vld [vmem:[%s2896_s9 + $0x38] sm:$0xff]  ;;  %s2050_s11 = scalar_lea.sflag [#allocation4], %s2885_s15  ;;  %s2645_s29 = sshra.s32 %s2063_s23, 4  ;;  %s2646_s29 = int_to_ptr.hbm [resolvable:$true] %s2645_s29 }
  0x56   : > { %2191 = vmatpush.msra.mxu3 %v417_v1  ;;  %438 = vmatpush.msra.mxu0 %v417_v1  ;;  %v407_v6 = vld [vmem:[#allocation7 + $0x90] sm:$0xff]  ;;  %v405_v7 = vld [vmem:[#allocation7 + $0x80] sm:$0xff]  ;;  %v2931_v21 = vld [vmem:[%s2896_s9 + $0x48] sm:$0xff]  ;;  %s2647_s0 = scalar_lea.hbm %s2646_s29, 1  ;;  %s2651_s12 = scalar_lea.hbm %s3773_s7, 2 }
  0x57   : > { %v403_v8 = vld [vmem:[#allocation7 + $0x70] sm:$0xff]  ;;  %v401_v9 = vld [vmem:[#allocation7 + $0x60] sm:$0xff]  ;;  %v2943_v24 = vld [vmem:[%s2896_s9 + $0x8] sm:$0xff]  ;;  %p2648_p1 = scmp.ne.s32.totalorder %s2646_s29, %s2647_s0  ;;  %p2652_p9 = scmp.lt.s32.totalorder %s2646_s29, %s3773_s7 }
  0x58   : > { %2192 = vmatpush.msra.mxu3 %v415_v2  ;;  %439 = vmatpush.msra.mxu0 %v415_v2  ;;  %v399_v10 = vld [vmem:[#allocation7 + $0x50] sm:$0xff]  ;;  %v397_v11 = vld [vmem:[#allocation7 + $0x40] sm:$0xff]  ;;  %v2947_v25 = vld [vmem:[%s2896_s9 + $0x58] sm:$0xff]  ;;  %p2653_p10 = scmp.lt.s32.totalorder %s2651_s12, %s2647_s0 }
  0x59   : > { %v395_v12 = vld [vmem:[#allocation7 + $0x30] sm:$0xff]  ;;  %v393_v13 = vld [vmem:[#allocation7 + $0x20] sm:$0xff]  ;;  %v2958_v28 = vld [vmem:[%s2896_s9 + $0x18] sm:$0xff]  ;;  %p2649_p4 = pnand %p2648_p1, %p2830_p5 }
  0x5a   : > { %2193 = vmatpush.msra.mxu3 %v413_v3  ;;  %440 = vmatpush.msra.mxu0 %v413_v3  ;;  %v391_v14 = vld [vmem:[#allocation7 + $0x10] sm:$0xff]  ;;  %v389_v15 = vld [vmem:[#allocation7] sm:$0xff]  ;;  %v2963_v29 = vld [vmem:[%s2896_s9 + $0x68] sm:$0xff]  ;;  %p2654_p2 = por %p2653_p10, %p2652_p9 }
  0x5b   : > { %v2911_v16 = vld [vmem:[%s2896_s9 + $0x20] sm:$0xff]  ;;  %v2919_v18 = vld [vmem:[%s2896_s9 + $0x30] sm:$0xff]  ;;  %v2971_v31 = vld [vmem:[%s2896_s9 + $0x78] sm:$0xff]  ;;  %p2650_p8 = pneg %p2649_p4 }
  0x5c   : > { %2194 = vmatpush.msra.mxu3 %v411_v4  ;;  %441 = vmatpush.msra.mxu0 %v411_v4  ;;  %v2927_v20 = vld [vmem:[%s2896_s9 + $0x40] sm:$0xff]  ;;  %v2939_v23 = vld [vmem:[%s2896_s9 + $0x50] sm:$0xff]  ;;  %v420_v49 = vld [vmem:[#allocation7 + $0xf8] sm:$0xff] }
  0x5d   : > { %v2935_v22 = vld [vmem:[%s2896_s9] sm:$0xff]  ;;  %v2951_v26 = vld [vmem:[%s2896_s9 + $0x10] sm:$0xff]  ;;  %502 = vmatpush.msra.mxu1 %v420_v49  ;;  %v418_v52 = vld [vmem:[#allocation7 + $0xe8] sm:$0xff]  ;;  %p2655_p11 = pnand %p2654_p2, %p2650_p8 }
  0x5e   : > { %2195 = vmatpush.msra.mxu3 %v409_v5  ;;  %442 = vmatpush.msra.mxu0 %v409_v5  ;;  %v2955_v27 = vld [vmem:[%s2896_s9 + $0x60] sm:$0xff]  ;;  %v2967_v30 = vld [vmem:[%s2896_s9 + $0x70] sm:$0xff]  ;;  %v416_v58 = vld [vmem:[#allocation7 + $0xd8] sm:$0xff] }
  0x5f   : > { %503 = vmatpush.msra.mxu1 %v418_v52  ;;  %v414_v63 = vld [vmem:[#allocation7 + $0xc8] sm:$0xff] }
  0x60   : > { %2196 = vmatpush.msra.mxu3 %v407_v6  ;;  %443 = vmatpush.msra.mxu0 %v407_v6 }
  0x61   : > { %504 = vmatpush.msra.mxu1 %v416_v58 }
  0x62   : > { %2197 = vmatpush.msra.mxu3 %v405_v7  ;;  %444 = vmatpush.msra.mxu0 %v405_v7 }
  0x63   : > { %505 = vmatpush.msra.mxu1 %v414_v63 }
  0x64   : > { %2198 = vmatpush.msra.mxu3 %v403_v8  ;;  %445 = vmatpush.msra.mxu0 %v403_v8 }
  0x66   : > { %2199 = vmatpush.msra.mxu3 %v401_v9  ;;  %446 = vmatpush.msra.mxu0 %v401_v9 }
  0x68   : > { %2200 = vmatpush.msra.mxu3 %v399_v10  ;;  %447 = vmatpush.msra.mxu0 %v399_v10 }
  0x6a   : > { %2201 = vmatpush.msra.mxu3 %v397_v11  ;;  %448 = vmatpush.msra.mxu0 %v397_v11 }
  0x6c   : > { %2202 = vmatpush.msra.mxu3 %v395_v12  ;;  %449 = vmatpush.msra.mxu0 %v395_v12 }
  0x6e   : > { %2203 = vmatpush.msra.mxu3 %v393_v13  ;;  %450 = vmatpush.msra.mxu0 %v393_v13 }
  0x70   : > { %2204 = vmatpush.msra.mxu3 %v391_v14  ;;  %451 = vmatpush.msra.mxu0 %v391_v14 }
  0x72   : > { %2205 = vmatpush.msra.mxu3 %v389_v15  ;;  %452 = vmatpush.msra.mxu0 %v389_v15 }
  0x73   : > { %465 = vmatmul.f32.vlgmr.msra.gmra.mxu3 %v2911_v16  ;;  %453 = vmatmul.f32.vlgmr.msra.gmra.mxu0 %v2935_v22 }
  0x74   : > { %936 = vmatpush.msrb.mxu3 %v419_v0  ;;  %1001 = vmatpush.msrb.mxu0 %v420_v49  ;;  %v408_v49 = vld [vmem:[#allocation7 + $0x98] sm:$0xff] }
  0x76   : > { %937 = vmatpush.msrb.mxu3 %v417_v1  ;;  %1002 = vmatpush.msrb.mxu0 %v418_v52 }
  0x78   : > { %938 = vmatpush.msrb.mxu3 %v415_v2  ;;  %1003 = vmatpush.msrb.mxu0 %v416_v58  ;;  %v406_v58 = vld [vmem:[#allocation7 + $0x88] sm:$0xff] }
  0x7a   : > { %939 = vmatpush.msrb.mxu3 %v413_v3  ;;  %1004 = vmatpush.msrb.mxu0 %v414_v63 }
  0x7b   : > { %468 = vmatmul.f32.gmra.mxu3 %v2915_v17  ;;  %456 = vmatmul.f32.gmra.mxu0 %v2943_v24 }
  0x7c   : > { %940 = vmatpush.msrb.mxu3 %v411_v4 }
  0x7e   : > { %941 = vmatpush.msrb.mxu3 %v409_v5 }
  0x80   : > { %942 = vmatpush.msrb.mxu3 %v407_v6  ;;  %v412_v6 = vld [vmem:[#allocation7 + $0xb8] sm:$0xff] }
  0x81   : > { %506 = vmatpush.msra.mxu1 %v412_v6  ;;  %1005 = vmatpush.msrb.mxu0 %v412_v6 }
  0x82   : > { %943 = vmatpush.msrb.mxu3 %v405_v7 }
  0x83   : > { %471 = vmatmul.f32.gmra.mxu3 %v2919_v18  ;;  %459 = vmatmul.f32.gmra.mxu0 %v2951_v26 }
  0x84   : > { %944 = vmatpush.msrb.mxu3 %v403_v8 }
  0x86   : > { %945 = vmatpush.msrb.mxu3 %v401_v9 }
  0x88   : > { %946 = vmatpush.msrb.mxu3 %v399_v10 }
  0x8a   : > { %947 = vmatpush.msrb.mxu3 %v397_v11 }
  0x8b   : > { %474 = vmatmul.f32.gmra.mxu3 %v2923_v19  ;;  %462 = vmatmul.f32.gmra.mxu0 %v2958_v28 }
  0x8c   : > { %948 = vmatpush.msrb.mxu3 %v395_v12  ;;  %v410_v12 = vld [vmem:[#allocation7 + $0xa8] sm:$0xff] }
  0x8d   : > { %507 = vmatpush.msra.mxu1 %v410_v12  ;;  %1006 = vmatpush.msrb.mxu0 %v410_v12 }
  0x8e   : > { %949 = vmatpush.msrb.mxu3 %v393_v13 }
  0x8f   : > { %508 = vmatpush.msra.mxu1 %v408_v49  ;;  %1007 = vmatpush.msrb.mxu0 %v408_v49 }
  0x90   : > { %950 = vmatpush.msrb.mxu3 %v391_v14 }
  0x91   : > { %509 = vmatpush.msra.mxu1 %v406_v58  ;;  %1008 = vmatpush.msrb.mxu0 %v406_v58 }
  0x92   : > { %951 = vmatpush.msrb.mxu3 %v389_v15 }
  0x93   : > { %477 = vmatmul.f32.gmra.mxu3 %v2927_v20 }
  0x9b   : > { %480 = vmatmul.f32.gmra.mxu3 %v2931_v21 }
  0xa3   : > { %483 = vmatmul.f32.gmra.mxu3 %v2939_v23 }
  0xab   : > { %486 = vmatmul.f32.gmra.mxu3 %v2947_v25 }
  0xb3   : > { %489 = vmatmul.f32.gmra.mxu3 %v2955_v27 }
  0xbb   : > { %492 = vmatmul.f32.gmra.mxu3 %v2963_v29 }
  0xc3   : > { %495 = vmatmul.f32.gmra.mxu3 %v2967_v30 }
  0xcb   : > { %498 = vmatmul.f32.gmra.mxu3 %v2971_v31 }
  0xf0   : > { %v2992_v41 = vpop.f32.mrf.mxu0 }
  0xf6   : > { %v2974_v32 = vpop.f32.mrf.mxu3 }
  0xf8   : > { %v2996_v43 = vpop.f32.mrf.mxu0 }
  0xfe   : > { %v2976_v33 = vpop.f32.mrf.mxu3 }
 0x100   : > { %v3009_v56 = vpop.f32.mrf.mxu0 }
 0x106   : > { %v2978_v34 = vpop.f32.mrf.mxu3 }
 0x107   : > { %v589_v10 = vmul.f32 0.044715, %v2978_v34 }
 0x10e   : > { %v2980_v35 = vpop.f32.mrf.mxu3 }
 0x10f   : > { %v590_v4 = vmul.f32 0.044715, %v2980_v35 }
 0x116   : > { %v2982_v36 = vpop.f32.mrf.mxu3 }
 0x117   : > { %v591_v61 = vmul.f32 0.044715, %v2982_v36 }
 0x119   : > { %v607_v11 = vmul.f32 %v591_v61, %v2982_v36 }
 0x11e   : > { %v2984_v37 = vpop.f32.mrf.mxu3 }
 0x11f   : > { %v592_v59 = vmul.f32 0.044715, %v2984_v37 }
 0x121   : > { %v608_v7 = vmul.f32 %v592_v59, %v2984_v37 }
 0x123   : > { %v624_v52 = vmul.f32 %v608_v7, %v2984_v37  ;;  %v402_v7 = vld [vmem:[#allocation7 + $0x68] sm:$0xff] }
 0x126   : > { %v2986_v38 = vpop.f32.mrf.mxu3 }
 0x127   : > { %v593_v53 = vmul.f32 0.044715, %v2986_v38 }
 0x129   : > { %v609_v0 = vmul.f32 %v593_v53, %v2986_v38  ;;  %v587_v53 = vmul.f32 0.044715, %v2974_v32 }
 0x12b   : > { %v603_v6 = vmul.f32 %v587_v53, %v2974_v32 }
 0x12d   : > { %v619_v49 = vmul.f32 %v603_v6, %v2974_v32 }
 0x12e   : > { %v2988_v39 = vpop.f32.mrf.mxu3 }
 0x12f   : > { %v594_v50 = vmul.f32 0.044715, %v2988_v39 }
 0x131   : > { %v610_v60 = vmul.f32 %v594_v50, %v2988_v39 }
 0x133   : > { %v626_v9 = vmul.f32 %v610_v60, %v2988_v39 }
 0x136   : > { %v2990_v40 = vpop.f32.mrf.mxu3 }
 0x137   : > { %v595_v46 = vmul.f32 0.044715, %v2990_v40 }
 0x139   : > { %v611_v54 = vmul.f32 %v595_v46, %v2990_v40  ;;  %v588_v46 = vmul.f32 0.044715, %v2976_v33 }
 0x13b   : > { %v627_v3 = vmul.f32 %v611_v54, %v2990_v40  ;;  %v3037_v54 = vpop.f32.mrf.mxu0 }
 0x13d   : > { %v643_v15 = vadd.f32 %v627_v3, %v2990_v40 }
 0x13e   : > { %v2994_v42 = vpop.f32.mrf.mxu3 }
 0x13f   : > { %v596_v44 = vmul.f32 0.044715, %v2994_v42  ;;  %v659_v60 = vmul.f32 0.7978846, %v643_v15  ;;  %v584_v15 = vmul.f32 0.044715, %v2996_v43 }
 0x141   : > { %v612_v48 = vmul.f32 %v596_v44, %v2994_v42  ;;  %v625_v44 = vmul.f32 %v609_v0, %v2986_v38  ;;  %v604_v0 = vmul.f32 %v588_v46, %v2976_v33 }
 0x143   : > { %v628_v57 = vmul.f32 %v612_v48, %v2994_v42  ;;  %v606_v48 = vmul.f32 %v590_v4, %v2980_v35  ;;  %v641_v61 = vadd.f32 %v625_v44, %v2986_v38  ;;  %v640_v4 = vadd.f32 %v624_v52, %v2984_v37 }
 0x144   : > { %v620_v12 = vmul.f32 %v604_v0, %v2976_v33  ;;  %v583_v52 = vmul.f32 0.044715, %v2992_v41 }
 0x145   : > { %v644_v5 = vadd.f32 %v628_v57, %v2994_v42  ;;  %v605_v57 = vmul.f32 %v589_v10, %v2978_v34  ;;  %v622_v63 = vmul.f32 %v606_v48, %v2980_v35  ;;  %v656_v46 = vmul.f32 0.7978846, %v640_v4 }
 0x146   : > { %v2999_v45 = vpop.f32.mrf.mxu3 }
 0x147   : > { %v597_v47 = vmul.f32 0.044715, %v2999_v45  ;;  %v581_v4 = vmul.f32 0.5, %v2999_v45 }
 0x149   : > { %v613_v51 = vmul.f32 %v597_v47, %v2999_v45  ;;  %v660_v47 = vmul.f32 0.7978846, %v644_v5  ;;  %v621_v5 = vmul.f32 %v605_v57, %v2978_v34 }
 0x14b   : > { %v629_v55 = vmul.f32 %v613_v51, %v2999_v45  ;;  %v642_v51 = vadd.f32 %v626_v9, %v2988_v39  ;;  %v657_v9 = vmul.f32 0.7978846, %v641_v61  ;;  %v637_v48 = vadd.f32 %v621_v5, %v2978_v34  ;;  %v396_v61 = vld [vmem:[#allocation7 + $0x38] sm:$0xff] }
 0x14d   : > { %v645_v2 = vadd.f32 %v629_v55, %v2999_v45  ;;  %v623_v55 = vmul.f32 %v607_v11, %v2982_v36  ;;  %v658_v3 = vmul.f32 0.7978846, %v642_v51  ;;  %v638_v11 = vadd.f32 %v622_v63, %v2980_v35 }
 0x14e   : > { %v3015_v62 = vpop.f32.mrf.mxu3 }
 0x14f   : > { %v598_v1 = vmul.f32 0.044715, %v3015_v62  ;;  %v661_v14 = vmul.f32 0.7978846, %v645_v2  ;;  %v586_v2 = vmul.f32 0.044715, %v3037_v54  ;;  %v639_v10 = vadd.f32 %v623_v55, %v2982_v36 }
 0x150   : > { %v582_v57 = vmul.f32 0.5, %v3015_v62  ;;  %v654_v0 = vmul.f32 0.7978846, %v638_v11  ;;  %v392_v11 = vld [vmem:[#allocation7 + $0x18] sm:$0xff] }
 0x151   : > { %v614_v8 = vmul.f32 %v598_v1, %v3015_v62  ;;  %2317 = vtanh.f32 %v661_v14  ;;  %v404_v1 = vld [vmem:[#allocation7 + $0x78] sm:$0xff]  ;;  %v602_v44 = vmul.f32 %v586_v2, %v3037_v54  ;;  %v655_v55 = vmul.f32 0.7978846, %v639_v10  ;;  %v394_v10 = vld [vmem:[#allocation7 + $0x28] sm:$0xff] }
 0x152   : > { %2319 = vtanh.f32 %v660_v47  ;;  %510 = vmatpush.msra.mxu1 %v404_v1  ;;  %1009 = vmatpush.msrb.mxu0 %v404_v1  ;;  %v600_v2 = vmul.f32 %v584_v15, %v2996_v43 }
 0x153   : > { %v630_v13 = vmul.f32 %v614_v8, %v3015_v62  ;;  %v585_v8 = vmul.f32 0.044715, %v3009_v56  ;;  %v618_v1 = vmul.f32 %v602_v44, %v3037_v54 }
 0x154   : > { %511 = vmatpush.msra.mxu1 %v402_v7  ;;  %1010 = vmatpush.msrb.mxu0 %v402_v7  ;;  %v653_v7 = vmul.f32 0.7978846, %v637_v48 }
 0x155   : > { %v646_v50 = vadd.f32 %v630_v13, %v3015_v62  ;;  %v400_v13 = vld [vmem:[#allocation7 + $0x58] sm:$0xff]  ;;  %v601_v53 = vmul.f32 %v585_v8, %v3009_v56  ;;  %v635_v62 = vadd.f32 %v619_v49, %v2974_v32  ;;  %v634_v44 = vadd.f32 %v618_v1, %v3037_v54 }
 0x156   : > { %512 = vmatpush.msra.mxu1 %v400_v13  ;;  %1011 = vmatpush.msrb.mxu0 %v400_v13  ;;  %v580_v13 = vmul.f32 0.5, %v2994_v42  ;;  %v579_v49 = vmul.f32 0.5, %v2990_v40 }
 0x157   : > { %v662_v59 = vmul.f32 0.7978846, %v646_v50  ;;  %v2318_v14 = vpop.eup %2317  ;;  %v398_v50 = vld [vmem:[#allocation7 + $0x48] sm:$0xff]  ;;  %v617_v8 = vmul.f32 %v601_v53, %v3009_v56  ;;  %v651_v42 = vmul.f32 0.7978846, %v635_v62 }
 0x158   : > { %v2320_v47 = vpop.eup %2319  ;;  %513 = vmatpush.msra.mxu1 %v398_v50  ;;  %1012 = vmatpush.msrb.mxu0 %v398_v50 }
 0x159   : > { %2321 = vtanh.f32 %v662_v59  ;;  %v693_v59 = vadd.f32 1.0, %v2318_v14  ;;  %v692_v5 = vadd.f32 1.0, %v2320_v47  ;;  %v390_v47 = vld [vmem:[#allocation7 + $0x8] sm:$0xff] }
 0x15a   : > { %2323 = vtanh.f32 %v659_v60  ;;  %v636_v60 = vadd.f32 %v620_v12, %v2976_v33  ;;  %514 = vmatpush.msra.mxu1 %v396_v61  ;;  %1013 = vmatpush.msrb.mxu0 %v396_v61 }
 0x15b   : > { %2325 = vtanh.f32 %v658_v3  ;;  %v709_v12 = vmul.f32 %v693_v59, %v581_v4  ;;  %v708_v48 = vmul.f32 %v692_v5, %v580_v13  ;;  %v576_v4 = vmul.f32 0.5, %v2984_v37 }
 0x15c   : > { %2327 = vtanh.f32 %v657_v9  ;;  %v599_v9 = vmul.f32 %v583_v52, %v2992_v41  ;;  %515 = vmatpush.msra.mxu1 %v394_v10  ;;  %v652_v45 = vmul.f32 0.7978846, %v636_v60  ;;  %1014 = vmatpush.msrb.mxu0 %v394_v10  ;;  %v633_v52 = vadd.f32 %v617_v8, %v3009_v56 }
 0x15d   : > { %2329 = vtanh.f32 %v656_v46  ;;  %v616_v46 = vmul.f32 %v600_v2, %v2996_v43  ;;  %v650_v60 = vmul.f32 0.7978846, %v634_v44  ;;  %v572_v44 = vmul.f32 0.5, %v2976_v33 }
 0x15e   : > { %2331 = vtanh.f32 %v655_v55  ;;  %516 = vmatpush.msra.mxu1 %v392_v11  ;;  %v615_v53 = vmul.f32 %v599_v9, %v2992_v41  ;;  %1015 = vmatpush.msrb.mxu0 %v392_v11  ;;  %v649_v2 = vmul.f32 0.7978846, %v633_v52  ;;  %v574_v11 = vmul.f32 0.5, %v2980_v35 }
 0x15f   : > { %v2322_v51 = vpop.eup %2321  ;;  %2333 = vtanh.f32 %v654_v0  ;;  %v632_v40 = vadd.f32 %v616_v46, %v2996_v43 }
 0x160   : > { %v694_v58 = vadd.f32 1.0, %v2322_v51  ;;  %v2324_v63 = vpop.eup %2323  ;;  %2335 = vtanh.f32 %v653_v7  ;;  %517 = vmatpush.msra.mxu1 %v390_v47  ;;  %1016 = vmatpush.msrb.mxu0 %v390_v47  ;;  %v575_v7 = vmul.f32 0.5, %v2982_v36 }
 0x161   : > { %v2326_v6 = vpop.eup %2325  ;;  %v691_v14 = vadd.f32 1.0, %v2324_v63  ;;  %2337 = vtanh.f32 %v652_v45  ;;  %518 = vmatmul.f32.vlgmr.msra.gmra.mxu1 %v2935_v22  ;;  %v577_v63 = vmul.f32 0.5, %v2986_v38 }
 0x162   : > { %v710_v3 = vmul.f32 %v694_v58, %v582_v57  ;;  %v2328_v15 = vpop.eup %2327  ;;  %v690_v50 = vadd.f32 1.0, %v2326_v6  ;;  %v578_v57 = vmul.f32 0.5, %v2988_v39  ;;  %2339 = vtanh.f32 %v651_v42 }
 0x163   : > { %v2330_v51 = vpop.eup %2329  ;;  %v707_v55 = vmul.f32 %v691_v14, %v579_v49  ;;  %v689_v58 = vadd.f32 1.0, %v2328_v15  ;;  %v631_v39 = vadd.f32 %v615_v53, %v2992_v41  ;;  %2341 = vtanh.f32 %v650_v60  ;;  %v3155_v60 = vld [vmem:[%s2889_s21 + $0x68] sm:$0xff] }
 0x164   : > { %711 = vmatpush.msra.mxu2 %v710_v3  ;;  %v2332_v59 = vpop.eup %2331  ;;  %v706_v61 = vmul.f32 %v690_v50, %v578_v57  ;;  %v688_v0 = vadd.f32 1.0, %v2330_v51  ;;  %v648_v6 = vmul.f32 0.7978846, %v632_v40  ;;  %2343 = vtanh.f32 %v649_v2 }
 0x165   : > { %v2334_v1 = vpop.eup %2333  ;;  %v705_v3 = vmul.f32 %v689_v58, %v577_v63  ;;  %v687_v5 = vadd.f32 1.0, %v2332_v59  ;;  %v647_v9 = vmul.f32 0.7978846, %v631_v39  ;;  %v573_v14 = vmul.f32 0.5, %v2978_v34  ;;  %v3090_v59 = vld [vmem:[%s2889_s21] sm:$0xff] }
 0x166   : > { %712 = vmatpush.msra.mxu2 %v709_v12  ;;  %v2336_v62 = vpop.eup %2335  ;;  %v704_v22 = vmul.f32 %v688_v0, %v576_v4  ;;  %v686_v8 = vadd.f32 1.0, %v2334_v1  ;;  %2345 = vtanh.f32 %v648_v6  ;;  %v570_v49 = vmul.f32 0.5, %v3037_v54 }
 0x167   : > { %v2338_v38 = vpop.eup %2337  ;;  %v703_v10 = vmul.f32 %v687_v5, %v575_v7  ;;  %v685_v12 = vadd.f32 1.0, %v2336_v62  ;;  %2347 = vtanh.f32 %v647_v9  ;;  %v569_v34 = vmul.f32 0.5, %v3009_v56 }
 0x168   : > { %713 = vmatpush.msra.mxu2 %v708_v48  ;;  %v2340_v13 = vpop.eup %2339  ;;  %v702_v37 = vmul.f32 %v686_v8, %v574_v11  ;;  %v684_v15 = vadd.f32 1.0, %v2338_v38  ;;  %v571_v48 = vmul.f32 0.5, %v2974_v32  ;;  %v568_v53 = vmul.f32 0.5, %v2996_v43  ;;  %v3105_v43 = vld [vmem:[%s2889_s21 + $0x18] sm:$0xff] }
 0x169   : > { %521 = vmatmul.f32.gmra.mxu1 %v2943_v24  ;;  %v2342_v45 = vpop.eup %2341  ;;  %v701_v36 = vmul.f32 %v685_v12, %v573_v14  ;;  %v683_v46 = vadd.f32 1.0, %v2340_v13  ;;  %v567_v54 = vmul.f32 0.5, %v2992_v41  ;;  %v3100_v41 = vld [vmem:[%s2889_s21 + $0x10] sm:$0xff] }
 0x16a   : > { %714 = vmatpush.msra.mxu2 %v707_v55  ;;  %v2344_v47 = vpop.eup %2343  ;;  %v700_v35 = vmul.f32 %v684_v15, %v572_v44  ;;  %v682_v24 = vadd.f32 1.0, %v2342_v45 }
 0x16b   : > { %v699_v51 = vmul.f32 %v683_v46, %v571_v48  ;;  %v681_v42 = vadd.f32 1.0, %v2344_v47 }
 0x16c   : > { %715 = vmatpush.msra.mxu2 %v706_v61  ;;  %v2346_v50 = vpop.eup %2345  ;;  %v698_v33 = vmul.f32 %v682_v24, %v570_v49  ;;  %v3163_v61 = vld [vmem:[%s2889_s21 + $0x78] sm:$0xff] }
 0x16d   : > { %v2348_v52 = vpop.eup %2347  ;;  %v680_v55 = vadd.f32 1.0, %v2346_v50  ;;  %v697_v32 = vmul.f32 %v681_v42, %v569_v34 }
 0x16e   : > { %716 = vmatpush.msra.mxu2 %v705_v3  ;;  %v679_v57 = vadd.f32 1.0, %v2348_v52 }
 0x16f   : > { %v696_v56 = vmul.f32 %v680_v55, %v568_v53 }
 0x170   : > { %717 = vmatpush.msra.mxu2 %v704_v22  ;;  %v695_v58 = vmul.f32 %v679_v57, %v567_v54 }
 0x171   : > { %524 = vmatmul.f32.gmra.mxu1 %v2951_v26  ;;  %v3095_v26 = vld [vmem:[%s2889_s21 + $0x8] sm:$0xff] }
 0x172   : > { %718 = vmatpush.msra.mxu2 %v703_v10 }
 0x174   : > { %719 = vmatpush.msra.mxu2 %v702_v37 }
 0x176   : > { %720 = vmatpush.msra.mxu2 %v701_v36 }
 0x178   : > { %721 = vmatpush.msra.mxu2 %v700_v35 }
 0x179   : > { %527 = vmatmul.f32.gmra.mxu1 %v2958_v28  ;;  %v3110_v28 = vld [vmem:[%s2889_s21 + $0x20] sm:$0xff] }
 0x17a   : > { %722 = vmatpush.msra.mxu2 %v699_v51 }
 0x17c   : > { %723 = vmatpush.msra.mxu2 %v698_v33 }
 0x17e   : > { %724 = vmatpush.msra.mxu2 %v697_v32 }
 0x180   : > { %725 = vmatpush.msra.mxu2 %v696_v56 }
 0x181   : > { %530 = vmatmul.f32.gmra.mxu1 %v2911_v16  ;;  %v3115_v16 = vld [vmem:[%s2889_s21 + $0x28] sm:$0xff] }
 0x182   : > { %726 = vmatpush.msra.mxu2 %v695_v58 }
 0x183   : > { %727 = vmatmul.f32.vlgmr.msra.gmra.mxu2 %v3090_v59 }
 0x189   : > { %533 = vmatmul.f32.gmra.mxu1 %v2915_v17  ;;  %v3120_v17 = vld [vmem:[%s2889_s21 + $0x30] sm:$0xff] }
 0x18b   : > { %730 = vmatmul.f32.gmra.mxu2 %v3095_v26 }
 0x191   : > { %536 = vmatmul.f32.gmra.mxu1 %v2919_v18  ;;  %v3125_v18 = vld [vmem:[%s2889_s21 + $0x38] sm:$0xff] }
 0x193   : > { %733 = vmatmul.f32.gmra.mxu2 %v3100_v41 }
 0x199   : > { %539 = vmatmul.f32.gmra.mxu1 %v2923_v19  ;;  %v3130_v19 = vld [vmem:[%s2889_s21 + $0x40] sm:$0xff] }
 0x19b   : > { %736 = vmatmul.f32.gmra.mxu2 %v3105_v43 }
 0x1a1   : > { %542 = vmatmul.f32.gmra.mxu1 %v2927_v20  ;;  %v3135_v20 = vld [vmem:[%s2889_s21 + $0x48] sm:$0xff] }
 0x1a3   : > { %739 = vmatmul.f32.gmra.mxu2 %v3110_v28 }
 0x1a9   : > { %545 = vmatmul.f32.gmra.mxu1 %v2931_v21  ;;  %v3140_v21 = vld [vmem:[%s2889_s21 + $0x50] sm:$0xff] }
 0x1ab   : > { %742 = vmatmul.f32.gmra.mxu2 %v3115_v16 }
 0x1b1   : > { %548 = vmatmul.f32.gmra.mxu1 %v2939_v23  ;;  %v3145_v23 = vld [vmem:[%s2889_s21 + $0x58] sm:$0xff] }
 0x1b3   : > { %745 = vmatmul.f32.gmra.mxu2 %v3120_v17 }
 0x1b9   : > { %551 = vmatmul.f32.gmra.mxu1 %v2947_v25  ;;  %v3150_v25 = vld [vmem:[%s2889_s21 + $0x60] sm:$0xff] }
 0x1bb   : > { %748 = vmatmul.f32.gmra.mxu2 %v3125_v18 }
 0x1c1   : > { %554 = vmatmul.f32.gmra.mxu1 %v2955_v27 }
 0x1c3   : > { %751 = vmatmul.f32.gmra.mxu2 %v3130_v19 }
 0x1c9   : > { %557 = vmatmul.f32.gmra.mxu1 %v2963_v29  ;;  %v3159_v29 = vld [vmem:[%s2889_s21 + $0x70] sm:$0xff] }
 0x1cb   : > { %754 = vmatmul.f32.gmra.mxu2 %v3135_v20 }
 0x1d1   : > { %560 = vmatmul.f32.gmra.mxu1 %v2967_v30 }
 0x1d3   : > { %757 = vmatmul.f32.gmra.mxu2 %v3140_v21 }
 0x1d9   : > { %563 = vmatmul.f32.gmra.mxu1 %v2971_v31 }
 0x1db   : > { %760 = vmatmul.f32.gmra.mxu2 %v3145_v23 }
 0x1de   : > { %v519_v27 = vpop.f32.mrf.mxu1 }
 0x1e3   : > { %763 = vmatmul.f32.gmra.mxu2 %v3150_v25 }
 0x1e6   : > { %v522_v40 = vpop.f32.mrf.mxu1 }
 0x1eb   : > { %766 = vmatmul.f32.gmra.mxu2 %v3155_v60 }
 0x1ee   : > { %v525_v30 = vpop.f32.mrf.mxu1 }
 0x1f3   : > { %769 = vmatmul.f32.gmra.mxu2 %v3159_v29 }
 0x1f6   : > { %v528_v63 = vpop.f32.mrf.mxu1 }
 0x1fb   : > { %772 = vmatmul.f32.gmra.mxu2 %v3163_v61 }
 0x1fe   : > { %v531_v4 = vpop.f32.mrf.mxu1 }
 0x206   : > { %v728_v0 = vpop.f32.mrf.mxu2  ;;  %v534_v11 = vpop.f32.mrf.mxu1 }
 0x207   : > { %v776_v31 = vadd.f32 %v728_v0, %v519_v27 }
 0x209   : > { %v808_v1 = vmul.f32 0.044715, %v776_v31  ;;  %v792_v14 = vmul.f32 0.5, %v776_v31 }
 0x20b   : > { %v824_v2 = vmul.f32 %v808_v1, %v776_v31 }
 0x20d   : > { %v840_v39 = vmul.f32 %v824_v2, %v776_v31 }
 0x20e   : > { %v731_v3 = vpop.f32.mrf.mxu2  ;;  %v537_v34 = vpop.f32.mrf.mxu1 }
 0x20f   : > { %v777_v5 = vadd.f32 %v731_v3, %v522_v40  ;;  %v856_v62 = vadd.f32 %v840_v39, %v776_v31 }
 0x211   : > { %v872_v6 = vmul.f32 0.7978846, %v856_v62  ;;  %v809_v22 = vmul.f32 0.044715, %v777_v5  ;;  %v793_v50 = vmul.f32 0.5, %v777_v5 }
 0x213   : > { %2349 = vtanh.f32 %v872_v6  ;;  %v825_v7 = vmul.f32 %v809_v22, %v777_v5 }
 0x215   : > { %v841_v8 = vmul.f32 %v825_v7, %v777_v5 }
 0x216   : > { %v734_v38 = vpop.f32.mrf.mxu2 }
 0x217   : > { %v778_v9 = vadd.f32 %v734_v38, %v525_v30  ;;  %v857_v10 = vadd.f32 %v841_v8, %v777_v5 }
 0x219   : > { %v2350_v12 = vpop.eup %2349  ;;  %v873_v13 = vmul.f32 0.7978846, %v857_v10  ;;  %v810_v37 = vmul.f32 0.044715, %v778_v9  ;;  %v794_v58 = vmul.f32 0.5, %v778_v9 }
 0x21a   : > { %v904_v15 = vadd.f32 1.0, %v2350_v12 }
 0x21b   : > { %2351 = vtanh.f32 %v873_v13  ;;  %v826_v45 = vmul.f32 %v810_v37, %v778_v9 }
 0x21c   : > { %v920_v36 = vmul.f32 %v904_v15, %v792_v14 }
 0x21d   : > { %v842_v44 = vmul.f32 %v826_v45, %v778_v9 }
 0x21e   : > { %v737_v46 = vpop.f32.mrf.mxu2  ;;  %952 = vmatmul.f32.vlgmr.msrb.gmra.mxu3 %v920_v36  ;;  %1017 = vmatmul.f32.vlgmr.msrb.gmra.mxu0 %v920_v36 }
 0x21f   : > { %v779_v47 = vadd.f32 %v737_v46, %v528_v63  ;;  %v858_v35 = vadd.f32 %v842_v44, %v778_v9  ;;  %v540_v63 = vpop.f32.mrf.mxu1 }
 0x221   : > { %v2352_v48 = vpop.eup %2351  ;;  %v874_v49 = vmul.f32 0.7978846, %v858_v35  ;;  %v811_v24 = vmul.f32 0.044715, %v779_v47 }
 0x222   : > { %v905_v51 = vadd.f32 1.0, %v2352_v48 }
 0x223   : > { %2353 = vtanh.f32 %v874_v49  ;;  %v827_v42 = vmul.f32 %v811_v24, %v779_v47 }
 0x224   : > { %v921_v52 = vmul.f32 %v905_v51, %v793_v50 }
 0x225   : > { %v843_v33 = vmul.f32 %v827_v42, %v779_v47 }
 0x226   : > { %v740_v53 = vpop.f32.mrf.mxu2  ;;  %955 = vmatmul.f32.gmra.mxu3 %v921_v52  ;;  %1020 = vmatmul.f32.gmra.mxu0 %v921_v52 }
 0x227   : > { %v780_v55 = vadd.f32 %v740_v53, %v531_v4  ;;  %v859_v32 = vadd.f32 %v843_v33, %v779_v47  ;;  %v795_v4 = vmul.f32 0.5, %v779_v47  ;;  %v543_v38 = vpop.f32.mrf.mxu1 }
 0x229   : > { %v2354_v54 = vpop.eup %2353  ;;  %v875_v57 = vmul.f32 0.7978846, %v859_v32  ;;  %v812_v56 = vmul.f32 0.044715, %v780_v55 }
 0x22a   : > { %v906_v27 = vadd.f32 1.0, %v2354_v54 }
 0x22b   : > { %2355 = vtanh.f32 %v875_v57  ;;  %v828_v40 = vmul.f32 %v812_v56, %v780_v55 }
 0x22c   : > { %v922_v30 = vmul.f32 %v906_v27, %v794_v58 }
 0x22d   : > { %v844_v0 = vmul.f32 %v828_v40, %v780_v55 }
 0x22e   : > { %v743_v31 = vpop.f32.mrf.mxu2  ;;  %958 = vmatmul.f32.gmra.mxu3 %v922_v30  ;;  %1023 = vmatmul.f32.gmra.mxu0 %v922_v30 }
 0x22f   : > { %v781_v1 = vadd.f32 %v743_v31, %v534_v11  ;;  %v860_v2 = vadd.f32 %v844_v0, %v780_v55  ;;  %v796_v11 = vmul.f32 0.5, %v780_v55  ;;  %v546_v35 = vpop.f32.mrf.mxu1 }
 0x231   : > { %v2356_v39 = vpop.eup %2355  ;;  %v876_v3 = vmul.f32 0.7978846, %v860_v2  ;;  %v813_v5 = vmul.f32 0.044715, %v781_v1  ;;  %v797_v50 = vmul.f32 0.5, %v781_v1 }
 0x232   : > { %v907_v62 = vadd.f32 1.0, %v2356_v39 }
 0x233   : > { %2357 = vtanh.f32 %v876_v3  ;;  %v829_v6 = vmul.f32 %v813_v5, %v781_v1 }
 0x234   : > { %v923_v22 = vmul.f32 %v907_v62, %v795_v4 }
 0x235   : > { %v845_v7 = vmul.f32 %v829_v6, %v781_v1 }
 0x236   : > { %v746_v8 = vpop.f32.mrf.mxu2  ;;  %961 = vmatmul.f32.gmra.mxu3 %v923_v22  ;;  %1026 = vmatmul.f32.gmra.mxu0 %v923_v22 }
 0x237   : > { %v782_v9 = vadd.f32 %v746_v8, %v537_v34  ;;  %v861_v10 = vadd.f32 %v845_v7, %v781_v1  ;;  %v549_v27 = vpop.f32.mrf.mxu1 }
 0x239   : > { %v2358_v12 = vpop.eup %2357  ;;  %v877_v13 = vmul.f32 0.7978846, %v861_v10  ;;  %v814_v37 = vmul.f32 0.044715, %v782_v9  ;;  %v798_v56 = vmul.f32 0.5, %v782_v9 }
 0x23a   : > { %v908_v14 = vadd.f32 1.0, %v2358_v12 }
 0x23b   : > { %2359 = vtanh.f32 %v877_v13  ;;  %v830_v15 = vmul.f32 %v814_v37, %v782_v9 }
 0x23c   : > { %v924_v45 = vmul.f32 %v908_v14, %v796_v11 }
 0x23d   : > { %v846_v36 = vmul.f32 %v830_v15, %v782_v9 }
 0x23e   : > { %v749_v44 = vpop.f32.mrf.mxu2  ;;  %964 = vmatmul.f32.gmra.mxu3 %v924_v45  ;;  %1029 = vmatmul.f32.gmra.mxu0 %v924_v45 }
 0x23f   : > { %v783_v46 = vadd.f32 %v749_v44, %v540_v63  ;;  %v862_v47 = vadd.f32 %v846_v36, %v782_v9  ;;  %v552_v22 = vpop.f32.mrf.mxu1 }
 0x241   : > { %v2360_v48 = vpop.eup %2359  ;;  %v878_v49 = vmul.f32 0.7978846, %v862_v47  ;;  %v815_v24 = vmul.f32 0.044715, %v783_v46  ;;  %v799_v5 = vmul.f32 0.5, %v783_v46 }
 0x242   : > { %v909_v51 = vadd.f32 1.0, %v2360_v48 }
 0x243   : > { %2361 = vtanh.f32 %v878_v49  ;;  %v831_v34 = vmul.f32 %v815_v24, %v783_v46 }
 0x244   : > { %v925_v42 = vmul.f32 %v909_v51, %v797_v50 }
 0x245   : > { %v847_v52 = vmul.f32 %v831_v34, %v783_v46 }
 0x246   : > { %v752_v33 = vpop.f32.mrf.mxu2  ;;  %967 = vmatmul.f32.gmra.mxu3 %v925_v42  ;;  %1032 = vmatmul.f32.gmra.mxu0 %v925_v42 }
 0x247   : > { %v784_v53 = vadd.f32 %v752_v33, %v543_v38  ;;  %v863_v55 = vadd.f32 %v847_v52, %v783_v46  ;;  %v555_v44 = vpop.f32.mrf.mxu1 }
 0x249   : > { %v2362_v32 = vpop.eup %2361  ;;  %v879_v54 = vmul.f32 0.7978846, %v863_v55  ;;  %v816_v57 = vmul.f32 0.044715, %v784_v53  ;;  %v800_v37 = vmul.f32 0.5, %v784_v53 }
 0x24a   : > { %v910_v58 = vadd.f32 1.0, %v2362_v32 }
 0x24b   : > { %2363 = vtanh.f32 %v879_v54  ;;  %v832_v40 = vmul.f32 %v816_v57, %v784_v53 }
 0x24c   : > { %v926_v30 = vmul.f32 %v910_v58, %v798_v56 }
 0x24d   : > { %v848_v63 = vmul.f32 %v832_v40, %v784_v53 }
 0x24e   : > { %v755_v0 = vpop.f32.mrf.mxu2  ;;  %970 = vmatmul.f32.gmra.mxu3 %v926_v30  ;;  %1035 = vmatmul.f32.gmra.mxu0 %v926_v30 }
 0x24f   : > { %v785_v31 = vadd.f32 %v755_v0, %v546_v35  ;;  %v864_v1 = vadd.f32 %v848_v63, %v784_v53  ;;  %v558_v55 = vpop.f32.mrf.mxu1 }
 0x251   : > { %v2364_v2 = vpop.eup %2363  ;;  %v880_v39 = vmul.f32 0.7978846, %v864_v1  ;;  %v817_v3 = vmul.f32 0.044715, %v785_v31  ;;  %v801_v24 = vmul.f32 0.5, %v785_v31 }
 0x252   : > { %v911_v4 = vadd.f32 1.0, %v2364_v2 }
 0x253   : > { %2365 = vtanh.f32 %v880_v39  ;;  %v833_v62 = vmul.f32 %v817_v3, %v785_v31 }
 0x254   : > { %v927_v6 = vmul.f32 %v911_v4, %v799_v5 }
 0x255   : > { %v849_v7 = vmul.f32 %v833_v62, %v785_v31 }
 0x256   : > { %v758_v8 = vpop.f32.mrf.mxu2  ;;  %973 = vmatmul.f32.gmra.mxu3 %v927_v6  ;;  %1038 = vmatmul.f32.gmra.mxu0 %v927_v6 }
 0x257   : > { %v786_v38 = vadd.f32 %v758_v8, %v549_v27  ;;  %v865_v9 = vadd.f32 %v849_v7, %v785_v31  ;;  %v561_v3 = vpop.f32.mrf.mxu1 }
 0x259   : > { %v2366_v10 = vpop.eup %2365  ;;  %v881_v12 = vmul.f32 0.7978846, %v865_v9  ;;  %v818_v13 = vmul.f32 0.044715, %v786_v38  ;;  %v802_v56 = vmul.f32 0.5, %v786_v38 }
 0x25a   : > { %v912_v11 = vadd.f32 1.0, %v2366_v10 }
 0x25b   : > { %2367 = vtanh.f32 %v881_v12  ;;  %v834_v14 = vmul.f32 %v818_v13, %v786_v38 }
 0x25c   : > { %v928_v15 = vmul.f32 %v912_v11, %v800_v37 }
 0x25d   : > { %v850_v45 = vmul.f32 %v834_v14, %v786_v38 }
 0x25e   : > { %v761_v36 = vpop.f32.mrf.mxu2  ;;  %976 = vmatmul.f32.gmra.mxu3 %v928_v15  ;;  %1041 = vmatmul.f32.gmra.mxu0 %v928_v15 }
 0x25f   : > { %v787_v46 = vadd.f32 %v761_v36, %v552_v22  ;;  %v866_v47 = vadd.f32 %v850_v45, %v786_v38  ;;  %v564_v14 = vpop.f32.mrf.mxu1 }
 0x261   : > { %v2368_v35 = vpop.eup %2367  ;;  %v882_v48 = vmul.f32 0.7978846, %v866_v47  ;;  %v819_v49 = vmul.f32 0.044715, %v787_v46  ;;  %v803_v5 = vmul.f32 0.5, %v787_v46 }
 0x262   : > { %v913_v50 = vadd.f32 1.0, %v2368_v35 }
 0x263   : > { %2369 = vtanh.f32 %v882_v48  ;;  %v835_v51 = vmul.f32 %v819_v49, %v787_v46 }
 0x264   : > { %v929_v34 = vmul.f32 %v913_v50, %v801_v24 }
 0x265   : > { %v851_v42 = vmul.f32 %v835_v51, %v787_v46 }
 0x266   : > { %v764_v52 = vpop.f32.mrf.mxu2  ;;  %979 = vmatmul.f32.gmra.mxu3 %v929_v34  ;;  %1044 = vmatmul.f32.gmra.mxu0 %v929_v34 }
 0x267   : > { %v788_v33 = vadd.f32 %v764_v52, %v555_v44  ;;  %v867_v53 = vadd.f32 %v851_v42, %v787_v46 }
 0x269   : > { %v2370_v32 = vpop.eup %2369  ;;  %v820_v54 = vmul.f32 0.044715, %v788_v33  ;;  %v883_v57 = vmul.f32 0.7978846, %v867_v53  ;;  %v804_v13 = vmul.f32 0.5, %v788_v33 }
 0x26a   : > { %v914_v58 = vadd.f32 1.0, %v2370_v32 }
 0x26b   : > { %2371 = vtanh.f32 %v883_v57  ;;  %v836_v27 = vmul.f32 %v820_v54, %v788_v33 }
 0x26c   : > { %v930_v40 = vmul.f32 %v914_v58, %v802_v56 }
 0x26d   : > { %v852_v30 = vmul.f32 %v836_v27, %v788_v33 }
 0x26e   : > { %v767_v63 = vpop.f32.mrf.mxu2  ;;  %982 = vmatmul.f32.gmra.mxu3 %v930_v40  ;;  %1047 = vmatmul.f32.gmra.mxu0 %v930_v40 }
 0x26f   : > { %v789_v0 = vadd.f32 %v767_v63, %v558_v55  ;;  %v868_v31 = vadd.f32 %v852_v30, %v788_v33 }
 0x271   : > { %v2372_v1 = vpop.eup %2371  ;;  %v821_v2 = vmul.f32 0.044715, %v789_v0  ;;  %v884_v39 = vmul.f32 0.7978846, %v868_v31  ;;  %v805_v49 = vmul.f32 0.5, %v789_v0 }
 0x272   : > { %v915_v4 = vadd.f32 1.0, %v2372_v1 }
 0x273   : > { %2373 = vtanh.f32 %v884_v39  ;;  %v837_v62 = vmul.f32 %v821_v2, %v789_v0 }
 0x274   : > { %v931_v6 = vmul.f32 %v915_v4, %v803_v5 }
 0x275   : > { %v853_v22 = vmul.f32 %v837_v62, %v789_v0 }
 0x276   : > { %v770_v7 = vpop.f32.mrf.mxu2  ;;  %985 = vmatmul.f32.gmra.mxu3 %v931_v6  ;;  %1050 = vmatmul.f32.gmra.mxu0 %v931_v6 }
 0x277   : > { %v790_v8 = vadd.f32 %v770_v7, %v561_v3  ;;  %v869_v38 = vadd.f32 %v853_v22, %v789_v0 }
 0x279   : > { %v2374_v9 = vpop.eup %2373  ;;  %v822_v10 = vmul.f32 0.044715, %v790_v8  ;;  %v885_v12 = vmul.f32 0.7978846, %v869_v38  ;;  %v806_v53 = vmul.f32 0.5, %v790_v8 }
 0x27a   : > { %v916_v37 = vadd.f32 1.0, %v2374_v9 }
 0x27b   : > { %2375 = vtanh.f32 %v885_v12  ;;  %v838_v11 = vmul.f32 %v822_v10, %v790_v8 }
 0x27c   : > { %v932_v15 = vmul.f32 %v916_v37, %v804_v13 }
 0x27d   : > { %v854_v45 = vmul.f32 %v838_v11, %v790_v8 }
 0x27e   : > { %v773_v36 = vpop.f32.mrf.mxu2  ;;  %988 = vmatmul.f32.gmra.mxu3 %v932_v15  ;;  %1053 = vmatmul.f32.gmra.mxu0 %v932_v15 }
 0x27f   : > { %v791_v44 = vadd.f32 %v773_v36, %v564_v14  ;;  %v870_v46 = vadd.f32 %v854_v45, %v790_v8 }
 0x281   : > { %v2376_v47 = vpop.eup %2375  ;;  %v823_v35 = vmul.f32 0.044715, %v791_v44  ;;  %v886_v48 = vmul.f32 0.7978846, %v870_v46  ;;  %v807_v57 = vmul.f32 0.5, %v791_v44 }
 0x282   : > { %v917_v24 = vadd.f32 1.0, %v2376_v47 }
 0x283   : > { %2377 = vtanh.f32 %v886_v48  ;;  %v839_v50 = vmul.f32 %v823_v35, %v791_v44 }
 0x284   : > { %v933_v51 = vmul.f32 %v917_v24, %v805_v49 }
 0x285   : > { %v855_v34 = vmul.f32 %v839_v50, %v791_v44 }
 0x286   : > { %991 = vmatmul.f32.gmra.mxu3 %v933_v51  ;;  %1056 = vmatmul.f32.gmra.mxu0 %v933_v51 }
 0x287   : > { %v871_v42 = vadd.f32 %v855_v34, %v791_v44 }
 0x289   : > { %v2378_v52 = vpop.eup %2377  ;;  %v887_v33 = vmul.f32 0.7978846, %v871_v42 }
 0x28a   : > { %v918_v55 = vadd.f32 1.0, %v2378_v52 }
 0x28b   : > { %2379 = vtanh.f32 %v887_v33 }
 0x28c   : > { %v934_v32 = vmul.f32 %v918_v55, %v806_v53 }
 0x28e   : > { %994 = vmatmul.f32.gmra.mxu3 %v934_v32  ;;  %1059 = vmatmul.f32.gmra.mxu0 %v934_v32 }
 0x291   : > { %v2380_v54 = vpop.eup %2379 }
 0x292   : > { %v919_v56 = vadd.f32 1.0, %v2380_v54 }
 0x294   : > { %v935_v58 = vmul.f32 %v919_v56, %v807_v57 }
 0x296   : > { %997 = vmatmul.f32.gmra.mxu3 %v935_v58  ;;  %1062 = vmatmul.f32.gmra.mxu0 %v935_v58 }
 0x2a1   : > { %v3166_v27 = vpop.f32.mrf.mxu3 }
 0x2a9   : > { %v3168_v40 = vpop.f32.mrf.mxu3 }
 0x2b1   : > { %v3170_v30 = vpop.f32.mrf.mxu3 }
 0x2b9   : > { %v3172_v63 = vpop.f32.mrf.mxu3 }
 0x2c1   : > { %v3174_v0 = vpop.f32.mrf.mxu3 }
 0x2c9   : > { %v3176_v31 = vpop.f32.mrf.mxu3 }
 0x2ca   : > { %v1087_v54 = vmul.f32 0.044715, %v3176_v31 }
 0x2d1   : > { %v3178_v1 = vpop.f32.mrf.mxu3 }
 0x2d2   : > { %v1088_v42 = vmul.f32 0.044715, %v3178_v1 }
 0x2d9   : > { %v3180_v2 = vpop.f32.mrf.mxu3 }
 0x2da   : > { %v1089_v24 = vmul.f32 0.044715, %v3180_v2 }
 0x2dc   : > { %v1105_v56 = vmul.f32 %v1089_v24, %v3180_v2  ;;  %v1083_v24 = vmul.f32 0.044715, %v3168_v40 }
 0x2e1   : > { %v3182_v39 = vpop.f32.mrf.mxu3 }
 0x2e2   : > { %v1090_v36 = vmul.f32 0.044715, %v3182_v39 }
 0x2e4   : > { %v1106_v52 = vmul.f32 %v1090_v36, %v3182_v39 }
 0x2e9   : > { %v3184_v3 = vpop.f32.mrf.mxu3 }
 0x2ea   : > { %v1091_v15 = vmul.f32 0.044715, %v3184_v3 }
 0x2ec   : > { %v1107_v50 = vmul.f32 %v1091_v15, %v3184_v3  ;;  %v1121_v15 = vmul.f32 %v1105_v56, %v3180_v2 }
 0x2ee   : > { %v1123_v58 = vmul.f32 %v1107_v50, %v3184_v3 }
 0x2f1   : > { %v3186_v5 = vpop.f32.mrf.mxu3 }
 0x2f2   : > { %v1092_v13 = vmul.f32 0.044715, %v3186_v5 }
 0x2f4   : > { %v1108_v46 = vmul.f32 %v1092_v13, %v3186_v5 }
 0x2f6   : > { %v1124_v33 = vmul.f32 %v1108_v46, %v3186_v5  ;;  %v1084_v46 = vmul.f32 0.044715, %v3170_v30 }
 0x2f9   : > { %v3188_v4 = vpop.f32.mrf.mxu3 }
 0x2fa   : > { %v1093_v10 = vmul.f32 0.044715, %v3188_v4 }
 0x2fc   : > { %v1109_v45 = vmul.f32 %v1093_v10, %v3188_v4  ;;  %v1122_v10 = vmul.f32 %v1106_v52, %v3182_v39 }
 0x2fe   : > { %v1125_v51 = vmul.f32 %v1109_v45, %v3188_v4  ;;  %v1139_v45 = vadd.f32 %v1123_v58, %v3184_v3  ;;  %v1099_v58 = vmul.f32 %v1083_v24, %v3168_v40 }
 0x300   : > { %v1155_v52 = vmul.f32 0.7978846, %v1139_v45 }
 0x301   : > { %v3190_v62 = vpop.f32.mrf.mxu3 }
 0x302   : > { %v1094_v8 = vmul.f32 0.044715, %v3190_v62 }
 0x304   : > { %v1110_v37 = vmul.f32 %v1094_v8, %v3190_v62 }
 0x306   : > { %v1126_v47 = vmul.f32 %v1110_v37, %v3190_v62 }
 0x308   : > { %v1142_v53 = vadd.f32 %v1126_v47, %v3190_v62 }
 0x309   : > { %v3192_v6 = vpop.f32.mrf.mxu3 }
 0x30a   : > { %v1095_v22 = vmul.f32 0.044715, %v3192_v6  ;;  %v1158_v37 = vmul.f32 0.7978846, %v1142_v53  ;;  %v1082_v53 = vmul.f32 0.044715, %v3166_v27 }
 0x30c   : > { %v1111_v9 = vmul.f32 %v1095_v22, %v3192_v6  ;;  %v1141_v22 = vadd.f32 %v1125_v51, %v3188_v4 }
 0x30e   : > { %v1127_v14 = vmul.f32 %v1111_v9, %v3192_v6  ;;  %v1104_v9 = vmul.f32 %v1088_v42, %v3178_v1  ;;  %v1157_v36 = vmul.f32 0.7978846, %v1141_v22  ;;  %v1137_v42 = vadd.f32 %v1121_v15, %v3180_v2 }
 0x310   : > { %v1143_v49 = vadd.f32 %v1127_v14, %v3192_v6  ;;  %v1103_v14 = vmul.f32 %v1087_v54, %v3176_v31 }
 0x311   : > { %v3195_v7 = vpop.f32.mrf.mxu3 }
 0x312   : > { %v1096_v38 = vmul.f32 0.044715, %v3195_v7  ;;  %v1159_v57 = vmul.f32 0.7978846, %v1143_v49  ;;  %v1080_v15 = vmul.f32 0.5, %v3195_v7 }
 0x314   : > { %v1112_v12 = vmul.f32 %v1096_v38, %v3195_v7  ;;  %v1086_v38 = vmul.f32 0.044715, %v3174_v0 }
 0x316   : > { %v1128_v11 = vmul.f32 %v1112_v12, %v3195_v7  ;;  %v1140_v12 = vadd.f32 %v1124_v33, %v3186_v5  ;;  %v1102_v47 = vmul.f32 %v1086_v38, %v3174_v0 }
 0x318   : > { %v1144_v35 = vadd.f32 %v1128_v11, %v3195_v7  ;;  %v1085_v11 = vmul.f32 0.044715, %v3172_v63  ;;  %v1156_v49 = vmul.f32 0.7978846, %v1140_v12  ;;  %v1118_v54 = vmul.f32 %v1102_v47, %v3174_v0 }
 0x319   : > { %v998_v44 = vpop.f32.mrf.mxu3 }
 0x31a   : > { %v1097_v48 = vmul.f32 0.044715, %v998_v44  ;;  %v1160_v32 = vmul.f32 0.7978846, %v1144_v35  ;;  %v1120_v35 = vmul.f32 %v1104_v9, %v3178_v1  ;;  %v1101_v50 = vmul.f32 %v1085_v11, %v3172_v63 }
 0x31b   : > { %v1081_v22 = vmul.f32 0.5, %v998_v44  ;;  %v1098_v11 = vmul.f32 %v1082_v53, %v3166_v27 }
 0x31c   : > { %v1113_v34 = vmul.f32 %v1097_v48, %v998_v44  ;;  %2381 = vtanh.f32 %v1160_v32  ;;  %v1138_v48 = vadd.f32 %v1122_v10, %v3182_v39  ;;  %v1117_v10 = vmul.f32 %v1101_v50, %v3172_v63 }
 0x31d   : > { %2383 = vtanh.f32 %v1159_v57  ;;  %v1136_v57 = vadd.f32 %v1120_v35, %v3178_v1  ;;  %v1115_v50 = vmul.f32 %v1099_v58, %v3168_v40  ;;  %v1114_v53 = vmul.f32 %v1098_v11, %v3166_v27 }
 0x31e   : > { %v1129_v55 = vmul.f32 %v1113_v34, %v998_v44  ;;  %v1119_v34 = vmul.f32 %v1103_v14, %v3176_v31  ;;  %v1154_v56 = vmul.f32 0.7978846, %v1138_v48  ;;  %v1079_v48 = vmul.f32 0.5, %v3192_v6 }
 0x31f   : > { %v1152_v47 = vmul.f32 0.7978846, %v1136_v57  ;;  %v1131_v58 = vadd.f32 %v1115_v50, %v3168_v40  ;;  %v1075_v11 = vmul.f32 0.5, %v3184_v3  ;;  %v1072_v50 = vmul.f32 0.5, %v3178_v1 }
 0x320   : > { %v1145_v8 = vadd.f32 %v1129_v55, %v998_v44  ;;  %v1100_v55 = vmul.f32 %v1084_v46, %v3170_v30  ;;  %v1135_v12 = vadd.f32 %v1119_v34, %v3176_v31  ;;  %v1134_v46 = vadd.f32 %v1118_v54, %v3174_v0 }
 0x321   : > { %v1077_v54 = vmul.f32 0.5, %v3188_v4 }
 0x322   : > { %v1161_v13 = vmul.f32 0.7978846, %v1145_v8  ;;  %v2382_v51 = vpop.eup %2381  ;;  %v1116_v44 = vmul.f32 %v1100_v55, %v3170_v30  ;;  %v1151_v7 = vmul.f32 0.7978846, %v1135_v12  ;;  %v1150_v6 = vmul.f32 0.7978846, %v1134_v46 }
 0x323   : > { %v2384_v33 = vpop.eup %2383  ;;  %v1192_v38 = vadd.f32 1.0, %v2382_v51  ;;  %v1133_v51 = vadd.f32 %v1117_v10, %v3172_v63  ;;  %v1130_v10 = vadd.f32 %v1114_v53, %v3166_v27  ;;  %v1070_v53 = vmul.f32 0.5, %v3174_v0 }
 0x324   : > { %2385 = vtanh.f32 %v1161_v13  ;;  %v1153_v13 = vmul.f32 0.7978846, %v1137_v42  ;;  %v1191_v45 = vadd.f32 1.0, %v2384_v33  ;;  %v1078_v42 = vmul.f32 0.5, %v3190_v62 }
 0x325   : > { %2387 = vtanh.f32 %v1158_v37  ;;  %v3247_v37 = vpop.f32.mrf.mxu0  ;;  %v1208_v35 = vmul.f32 %v1192_v38, %v1080_v15  ;;  %v1132_v55 = vadd.f32 %v1116_v44, %v3170_v30  ;;  %v1067_v0 = vmul.f32 0.5, %v3168_v40 }
 0x326   : > { %2389 = vtanh.f32 %v1157_v36  ;;  %v1207_v34 = vmul.f32 %v1191_v45, %v1079_v48  ;;  %v1147_v45 = vmul.f32 0.7978846, %v1131_v58  ;;  %v1073_v48 = vmul.f32 0.5, %v3180_v2 }
 0x327   : > { %2391 = vtanh.f32 %v1156_v49  ;;  %v1148_v12 = vmul.f32 0.7978846, %v1132_v55 }
 0x328   : > { %2393 = vtanh.f32 %v1155_v52 }
 0x329   : > { %2395 = vtanh.f32 %v1154_v56 }
 0x32a   : > { %v2386_v32 = vpop.eup %2385  ;;  %2397 = vtanh.f32 %v1153_v13 }
 0x32b   : > { %v1193_v8 = vadd.f32 1.0, %v2386_v32  ;;  %v2388_v9 = vpop.eup %2387  ;;  %2399 = vtanh.f32 %v1152_v47  ;;  %v1146_v47 = vmul.f32 0.7978846, %v1130_v10 }
 0x32c   : > { %v2390_v36 = vpop.eup %2389  ;;  %v1190_v49 = vadd.f32 1.0, %v2388_v9  ;;  %2401 = vtanh.f32 %v1151_v7 }
 0x32d   : > { %v1209_v14 = vmul.f32 %v1193_v8, %v1081_v22  ;;  %v2392_v24 = vpop.eup %2391  ;;  %v1189_v52 = vadd.f32 1.0, %v2390_v36  ;;  %v1149_v22 = vmul.f32 0.7978846, %v1133_v51  ;;  %v1076_v8 = vmul.f32 0.5, %v3186_v5  ;;  %v3263_v13 = vpop.f32.mrf.mxu0 }
 0x32e   : > { %v2394_v33 = vpop.eup %2393  ;;  %v1206_v32 = vmul.f32 %v1190_v49, %v1078_v42  ;;  %v1188_v57 = vadd.f32 1.0, %v2392_v24  ;;  %2403 = vtanh.f32 %v1150_v6  ;;  %v1074_v36 = vmul.f32 0.5, %v3182_v39 }
 0x32f   : > { %1210 = vmatpush.msra.mxu0 %v1209_v14  ;;  %2206 = vmatpush.msrb.mxu1 %v1209_v14  ;;  %v2396_v56 = vpop.eup %2395  ;;  %v1205_v62 = vmul.f32 %v1189_v52, %v1077_v54  ;;  %v1187_v38 = vadd.f32 1.0, %v2394_v33  ;;  %2405 = vtanh.f32 %v1149_v22 }
 0x330   : > { %v2398_v9 = vpop.eup %2397  ;;  %v1204_v4 = vmul.f32 %v1188_v57, %v1076_v8  ;;  %v1186_v14 = vadd.f32 1.0, %v2396_v56  ;;  %2407 = vtanh.f32 %v1148_v12  ;;  %v1068_v56 = vmul.f32 0.5, %v3170_v30  ;;  %v1444_v12 = vld [vmem:[#allocation8 + $0x48] sm:$0xff] }
 0x331   : > { %1211 = vmatpush.msra.mxu0 %v1208_v35  ;;  %2207 = vmatpush.msrb.mxu1 %v1208_v35  ;;  %v2400_v15 = vpop.eup %2399  ;;  %v1203_v5 = vmul.f32 %v1187_v38, %v1075_v11  ;;  %v1185_v44 = vadd.f32 1.0, %v2398_v9  ;;  %2409 = vtanh.f32 %v1147_v45  ;;  %v1066_v38 = vmul.f32 0.5, %v3166_v27  ;;  %v1439_v11 = vld [vmem:[#allocation8 + $0x20] sm:$0xff]  ;;  %v1436_v45 = vld [vmem:[#allocation8 + $0x8] sm:$0xff] }
 0x332   : > { %v2402_v46 = vpop.eup %2401  ;;  %v1202_v35 = vmul.f32 %v1186_v14, %v1074_v36  ;;  %v1184_v49 = vadd.f32 1.0, %v2400_v15  ;;  %2411 = vtanh.f32 %v1146_v47  ;;  %v1438_v14 = vld [vmem:[#allocation8 + $0x18] sm:$0xff]  ;;  %v1437_v15 = vld [vmem:[#allocation8 + $0x10] sm:$0xff] }
 0x333   : > { %1212 = vmatpush.msra.mxu0 %v1207_v34  ;;  %2208 = vmatpush.msrb.mxu1 %v1207_v34  ;;  %v1201_v24 = vmul.f32 %v1185_v44, %v1073_v48  ;;  %v1183_v51 = vadd.f32 1.0, %v2402_v46  ;;  %v1071_v34 = vmul.f32 0.5, %v3176_v31 }
 0x334   : > { %v2404_v3 = vpop.eup %2403  ;;  %v1200_v39 = vmul.f32 %v1184_v49, %v1072_v50 }
 0x335   : > { %1213 = vmatpush.msra.mxu0 %v1206_v32  ;;  %2209 = vmatpush.msrb.mxu1 %v1206_v32  ;;  %v2406_v7 = vpop.eup %2405  ;;  %v1182_v42 = vadd.f32 1.0, %v2404_v3  ;;  %v3270_v33 = vpop.f32.mrf.mxu0  ;;  %v1199_v2 = vmul.f32 %v1183_v51, %v1071_v34  ;;  %v1069_v32 = vmul.f32 0.5, %v3172_v63 }
 0x336   : > { %v2408_v52 = vpop.eup %2407  ;;  %v1181_v55 = vadd.f32 1.0, %v2406_v7 }
 0x337   : > { %1214 = vmatpush.msra.mxu0 %v1205_v62  ;;  %2210 = vmatpush.msrb.mxu1 %v1205_v62  ;;  %v2410_v6 = vpop.eup %2409  ;;  %v1198_v1 = vmul.f32 %v1182_v42, %v1070_v53  ;;  %v1180_v54 = vadd.f32 1.0, %v2408_v52 }
 0x338   : > { %v2412_v57 = vpop.eup %2411  ;;  %v1197_v31 = vmul.f32 %v1181_v55, %v1069_v32  ;;  %v1179_v58 = vadd.f32 1.0, %v2410_v6 }
 0x339   : > { %1215 = vmatpush.msra.mxu0 %v1204_v4  ;;  %2211 = vmatpush.msrb.mxu1 %v1204_v4  ;;  %v1196_v22 = vmul.f32 %v1180_v54, %v1068_v56  ;;  %v1178_v62 = vadd.f32 1.0, %v2412_v57  ;;  %v1440_v4 = vld [vmem:[#allocation8 + $0x28] sm:$0xff] }
 0x33a   : > { %v1195_v8 = vmul.f32 %v1179_v58, %v1067_v0 }
 0x33b   : > { %1216 = vmatpush.msra.mxu0 %v1203_v5  ;;  %2212 = vmatpush.msrb.mxu1 %v1203_v5  ;;  %v1194_v9 = vmul.f32 %v1178_v62, %v1066_v38  ;;  %v1435_v5 = vld [vmem:[#allocation8] sm:$0xff] }
 0x33d   : > { %1217 = vmatpush.msra.mxu0 %v1202_v35  ;;  %2213 = vmatpush.msrb.mxu1 %v1202_v35  ;;  %v3277_v63 = vpop.f32.mrf.mxu0 }
 0x33f   : > { %1218 = vmatpush.msra.mxu0 %v1201_v24  ;;  %2214 = vmatpush.msrb.mxu1 %v1201_v24 }
 0x341   : > { %1219 = vmatpush.msra.mxu0 %v1200_v39  ;;  %2215 = vmatpush.msrb.mxu1 %v1200_v39 }
 0x343   : > { %1220 = vmatpush.msra.mxu0 %v1199_v2  ;;  %2216 = vmatpush.msrb.mxu1 %v1199_v2 }
 0x345   : > { %1221 = vmatpush.msra.mxu0 %v1198_v1  ;;  %2217 = vmatpush.msrb.mxu1 %v1198_v1  ;;  %v3281_v30 = vpop.f32.mrf.mxu0 }
 0x347   : > { %1222 = vmatpush.msra.mxu0 %v1197_v31  ;;  %2218 = vmatpush.msrb.mxu1 %v1197_v31 }
 0x349   : > { %1223 = vmatpush.msra.mxu0 %v1196_v22  ;;  %2219 = vmatpush.msrb.mxu1 %v1196_v22 }
 0x34b   : > { %1224 = vmatpush.msra.mxu0 %v1195_v8  ;;  %2220 = vmatpush.msrb.mxu1 %v1195_v8 }
 0x34d   : > { %1225 = vmatpush.msra.mxu0 %v1194_v9  ;;  %2221 = vmatpush.msrb.mxu1 %v1194_v9  ;;  %v3287_v27 = vpop.f32.mrf.mxu0 }
 0x34e   : > { %1226 = vmatmul.f32.vlgmr.msra.gmra.mxu0 %v3090_v59  ;;  %1235 = vmatmul.f32.vlgmr.msrb.gmra.mxu1 %v3105_v43 }
 0x355   : > { %v3290_v40 = vpop.f32.mrf.mxu0 }
 0x356   : > { %1229 = vmatmul.f32.gmra.mxu0 %v3095_v26  ;;  %1238 = vmatmul.f32.gmra.mxu1 %v3110_v28  ;;  %v1449_v28 = vld [vmem:[#allocation8 + $0x70] sm:$0xff] }
 0x35d   : > { %v3293_v59 = vpop.f32.mrf.mxu0 }
 0x35e   : > { %1232 = vmatmul.f32.gmra.mxu0 %v3100_v41  ;;  %1241 = vmatmul.f32.gmra.mxu1 %v3115_v16  ;;  %v1450_v41 = vld [vmem:[#allocation8 + $0x78] sm:$0xff]  ;;  %v1448_v16 = vld [vmem:[#allocation8 + $0x68] sm:$0xff] }
 0x35f   : > { %1451 = vmatpush.msrb.mxu0 %v1450_v41  ;;  %2222 = vmatpush.msrb.mxu2 %v1450_v41 }
 0x361   : > { %1452 = vmatpush.msrb.mxu0 %v1449_v28  ;;  %2223 = vmatpush.msrb.mxu2 %v1449_v28 }
 0x363   : > { %1453 = vmatpush.msrb.mxu0 %v1448_v16  ;;  %2224 = vmatpush.msrb.mxu2 %v1448_v16 }
 0x365   : > { %v3296_v43 = vpop.f32.mrf.mxu0 }
 0x366   : > { %1244 = vmatmul.f32.gmra.mxu1 %v3120_v17 }
 0x36d   : > { %v3300_v26 = vpop.f32.mrf.mxu0 }
 0x36e   : > { %1247 = vmatmul.f32.gmra.mxu1 %v3125_v18  ;;  %v1447_v18 = vld [vmem:[#allocation8 + $0x60] sm:$0xff] }
 0x36f   : > { %1454 = vmatpush.msrb.mxu0 %v1447_v18  ;;  %2225 = vmatpush.msrb.mxu2 %v1447_v18 }
 0x375   : > { %v3303_v17 = vpop.f32.mrf.mxu0 }
 0x376   : > { %1250 = vmatmul.f32.gmra.mxu1 %v3130_v19 }
 0x37d   : > { %v3306_v19 = vpop.f32.mrf.mxu0 }
 0x37e   : > { %1253 = vmatmul.f32.gmra.mxu1 %v3135_v20 }
 0x385   : > { %v3309_v20 = vpop.f32.mrf.mxu0 }
 0x386   : > { %1256 = vmatmul.f32.gmra.mxu1 %v3140_v21  ;;  %v1446_v21 = vld [vmem:[#allocation8 + $0x58] sm:$0xff] }
 0x387   : > { %1455 = vmatpush.msrb.mxu0 %v1446_v21  ;;  %2226 = vmatpush.msrb.mxu2 %v1446_v21 }
 0x38d   : > { %v3313_v10 = vpop.f32.mrf.mxu0 }
 0x38e   : > { %1259 = vmatmul.f32.gmra.mxu1 %v3145_v23  ;;  %v1445_v23 = vld [vmem:[#allocation8 + $0x50] sm:$0xff] }
 0x38f   : > { %1456 = vmatpush.msrb.mxu0 %v1445_v23  ;;  %2227 = vmatpush.msrb.mxu2 %v1445_v23 }
 0x391   : > { %1457 = vmatpush.msrb.mxu0 %v1444_v12  ;;  %2228 = vmatpush.msrb.mxu2 %v1444_v12 }
 0x396   : > { %1262 = vmatmul.f32.gmra.mxu1 %v3150_v25  ;;  %v1443_v25 = vld [vmem:[#allocation8 + $0x40] sm:$0xff] }
 0x397   : > { %1458 = vmatpush.msrb.mxu0 %v1443_v25  ;;  %2229 = vmatpush.msrb.mxu2 %v1443_v25 }
 0x39e   : > { %1265 = vmatmul.f32.gmra.mxu1 %v3155_v60  ;;  %v1442_v60 = vld [vmem:[#allocation8 + $0x38] sm:$0xff] }
 0x39f   : > { %1459 = vmatpush.msrb.mxu0 %v1442_v60  ;;  %2230 = vmatpush.msrb.mxu2 %v1442_v60 }
 0x3a6   : > { %1268 = vmatmul.f32.gmra.mxu1 %v3159_v29  ;;  %v1441_v29 = vld [vmem:[#allocation8 + $0x30] sm:$0xff] }
 0x3a7   : > { %1460 = vmatpush.msrb.mxu0 %v1441_v29  ;;  %2231 = vmatpush.msrb.mxu2 %v1441_v29 }
 0x3a9   : > { %1461 = vmatpush.msrb.mxu0 %v1440_v4  ;;  %2232 = vmatpush.msrb.mxu2 %v1440_v4 }
 0x3ab   : > { %1462 = vmatpush.msrb.mxu0 %v1439_v11  ;;  %2233 = vmatpush.msrb.mxu2 %v1439_v11 }
 0x3ad   : > { %1463 = vmatpush.msrb.mxu0 %v1438_v14  ;;  %2234 = vmatpush.msrb.mxu2 %v1438_v14 }
 0x3ae   : > { %1271 = vmatmul.f32.gmra.mxu1 %v3163_v61  ;;  %v3315_v61 = vpop.f32.mrf.mxu0 }
 0x3af   : > { %1464 = vmatpush.msrb.mxu0 %v1437_v15  ;;  %2235 = vmatpush.msrb.mxu2 %v1437_v15 }
 0x3b1   : > { %1465 = vmatpush.msrb.mxu0 %v1436_v45  ;;  %2236 = vmatpush.msrb.mxu2 %v1436_v45 }
 0x3b3   : > { %1466 = vmatpush.msrb.mxu0 %v1435_v5  ;;  %2237 = vmatpush.msrb.mxu2 %v1435_v5 }
 0x3b6   : > { %v3317_v36 = vpop.f32.mrf.mxu0 }
 0x3cb   : > { %v1227_v44 = vpop.f32.mrf.mxu0  ;;  %v1236_v46 = vpop.f32.mrf.mxu1 }
 0x3cc   : > { %v1275_v47 = vadd.f32 %v1227_v44, %v3247_v37  ;;  %v1278_v35 = vadd.f32 %v1236_v46, %v3277_v63 }
 0x3ce   : > { %v1307_v48 = vmul.f32 0.044715, %v1275_v47  ;;  %v1310_v49 = vmul.f32 0.044715, %v1278_v35  ;;  %v1291_v9 = vmul.f32 0.5, %v1275_v47  ;;  %v1294_v16 = vmul.f32 0.5, %v1278_v35 }
 0x3d0   : > { %v1323_v3 = vmul.f32 %v1307_v48, %v1275_v47  ;;  %v1326_v24 = vmul.f32 %v1310_v49, %v1278_v35 }
 0x3d2   : > { %v1339_v50 = vmul.f32 %v1323_v3, %v1275_v47  ;;  %v1342_v51 = vmul.f32 %v1326_v24, %v1278_v35 }
 0x3d3   : > { %v1230_v7 = vpop.f32.mrf.mxu0  ;;  %v1239_v39 = vpop.f32.mrf.mxu1 }
 0x3d4   : > { %v1276_v34 = vadd.f32 %v1230_v7, %v3263_v13  ;;  %v1279_v42 = vadd.f32 %v1239_v39, %v3281_v30  ;;  %v1355_v52 = vadd.f32 %v1339_v50, %v1275_v47  ;;  %v1358_v2 = vadd.f32 %v1342_v51, %v1278_v35 }
 0x3d6   : > { %v1308_v53 = vmul.f32 0.044715, %v1276_v34  ;;  %v1371_v55 = vmul.f32 0.7978846, %v1355_v52  ;;  %v1374_v6 = vmul.f32 0.7978846, %v1358_v2 }
 0x3d7   : > { %v1311_v37 = vmul.f32 0.044715, %v1279_v42  ;;  %v1292_v44 = vmul.f32 0.5, %v1276_v34  ;;  %v1295_v35 = vmul.f32 0.5, %v1279_v42 }
 0x3d8   : > { %2413 = vtanh.f32 %v1371_v55  ;;  %v1324_v1 = vmul.f32 %v1308_v53, %v1276_v34 }
 0x3d9   : > { %2415 = vtanh.f32 %v1374_v6  ;;  %v1327_v32 = vmul.f32 %v1311_v37, %v1279_v42 }
 0x3da   : > { %v1340_v54 = vmul.f32 %v1324_v1, %v1276_v34 }
 0x3db   : > { %v1233_v57 = vpop.f32.mrf.mxu0  ;;  %v1242_v31 = vpop.f32.mrf.mxu1  ;;  %v1343_v56 = vmul.f32 %v1327_v32, %v1279_v42 }
 0x3dc   : > { %v1277_v58 = vadd.f32 %v1233_v57, %v3270_v33  ;;  %v1280_v13 = vadd.f32 %v1242_v31, %v3287_v27  ;;  %v1356_v22 = vadd.f32 %v1340_v54, %v1276_v34 }
 0x3dd   : > { %v1359_v0 = vadd.f32 %v1343_v56, %v1279_v42 }
 0x3de   : > { %v2414_v62 = vpop.eup %2413  ;;  %v1309_v8 = vmul.f32 0.044715, %v1277_v58  ;;  %v1372_v38 = vmul.f32 0.7978846, %v1356_v22  ;;  %v1312_v28 = vmul.f32 0.044715, %v1280_v13 }
 0x3df   : > { %v2416_v63 = vpop.eup %2415  ;;  %v1403_v30 = vadd.f32 1.0, %v2414_v62  ;;  %v1375_v41 = vmul.f32 0.7978846, %v1359_v0  ;;  %v1293_v53 = vmul.f32 0.5, %v1277_v58  ;;  %v1296_v42 = vmul.f32 0.5, %v1280_v13 }
 0x3e0   : > { %v1406_v18 = vadd.f32 1.0, %v2416_v63  ;;  %2417 = vtanh.f32 %v1372_v38  ;;  %v1325_v21 = vmul.f32 %v1309_v8, %v1277_v58  ;;  %v1328_v12 = vmul.f32 %v1312_v28, %v1280_v13 }
 0x3e1   : > { %v1419_v23 = vmul.f32 %v1403_v30, %v1291_v9  ;;  %2419 = vtanh.f32 %v1375_v41 }
 0x3e2   : > { %v1422_v33 = vmul.f32 %v1406_v18, %v1294_v16  ;;  %v1341_v25 = vmul.f32 %v1325_v21, %v1277_v58  ;;  %v1344_v60 = vmul.f32 %v1328_v12, %v1280_v13 }
 0x3e3   : > { %v1245_v27 = vpop.f32.mrf.mxu1  ;;  %1467 = vmatmul.f32.vlgmr.msrb.gmra.mxu0 %v1419_v23 }
 0x3e4   : > { %v1281_v29 = vadd.f32 %v1245_v27, %v3290_v40  ;;  %1476 = vmatmul.f32.vlgmr.msrb.gmra.mxu2 %v1422_v33  ;;  %v1357_v4 = vadd.f32 %v1341_v25, %v1277_v58  ;;  %v1360_v11 = vadd.f32 %v1344_v60, %v1280_v13 }
 0x3e6   : > { %v2418_v14 = vpop.eup %2417  ;;  %v1373_v15 = vmul.f32 0.7978846, %v1357_v4  ;;  %v1313_v45 = vmul.f32 0.044715, %v1281_v29  ;;  %v1376_v47 = vmul.f32 0.7978846, %v1360_v11 }
 0x3e7   : > { %v2420_v5 = vpop.eup %2419  ;;  %v1404_v46 = vadd.f32 1.0, %v2418_v14  ;;  %v1297_v62 = vmul.f32 0.5, %v1281_v29 }
 0x3e8   : > { %v1407_v48 = vadd.f32 1.0, %v2420_v5  ;;  %2421 = vtanh.f32 %v1373_v15  ;;  %v1329_v49 = vmul.f32 %v1313_v45, %v1281_v29 }
 0x3e9   : > { %v1420_v3 = vmul.f32 %v1404_v46, %v1292_v44  ;;  %2423 = vtanh.f32 %v1376_v47 }
 0x3ea   : > { %v1423_v24 = vmul.f32 %v1407_v48, %v1295_v35  ;;  %v1345_v50 = vmul.f32 %v1329_v49, %v1281_v29 }
 0x3eb   : > { %v1248_v51 = vpop.f32.mrf.mxu1  ;;  %1470 = vmatmul.f32.gmra.mxu0 %v1420_v3 }
 0x3ec   : > { %v1282_v40 = vadd.f32 %v1248_v51, %v3293_v59  ;;  %1479 = vmatmul.f32.gmra.mxu2 %v1423_v24  ;;  %v1361_v7 = vadd.f32 %v1345_v50, %v1281_v29 }
 0x3ee   : > { %v2422_v39 = vpop.eup %2421  ;;  %v1377_v52 = vmul.f32 0.7978846, %v1361_v7  ;;  %v1314_v2 = vmul.f32 0.044715, %v1282_v40 }
 0x3ef   : > { %v2424_v34 = vpop.eup %2423  ;;  %v1405_v55 = vadd.f32 1.0, %v2422_v39 }
 0x3f0   : > { %v1408_v6 = vadd.f32 1.0, %v2424_v34  ;;  %2425 = vtanh.f32 %v1377_v52  ;;  %v1330_v37 = vmul.f32 %v1314_v2, %v1282_v40 }
 0x3f1   : > { %v1421_v1 = vmul.f32 %v1405_v55, %v1293_v53 }
 0x3f2   : > { %v1424_v32 = vmul.f32 %v1408_v6, %v1296_v42  ;;  %v1346_v54 = vmul.f32 %v1330_v37, %v1282_v40 }
 0x3f3   : > { %v1251_v57 = vpop.f32.mrf.mxu1  ;;  %1473 = vmatmul.f32.gmra.mxu0 %v1421_v1 }
 0x3f4   : > { %v1283_v31 = vadd.f32 %v1251_v57, %v3296_v43  ;;  %1482 = vmatmul.f32.gmra.mxu2 %v1424_v32  ;;  %v1362_v59 = vadd.f32 %v1346_v54, %v1282_v40  ;;  %v1298_v43 = vmul.f32 0.5, %v1282_v40 }
 0x3f6   : > { %v2426_v56 = vpop.eup %2425  ;;  %v1378_v22 = vmul.f32 0.7978846, %v1362_v59  ;;  %v1315_v0 = vmul.f32 0.044715, %v1283_v31 }
 0x3f7   : > { %v1409_v8 = vadd.f32 1.0, %v2426_v56 }
 0x3f8   : > { %2427 = vtanh.f32 %v1378_v22  ;;  %v1331_v58 = vmul.f32 %v1315_v0, %v1283_v31 }
 0x3f9   : > { %v1425_v13 = vmul.f32 %v1409_v8, %v1297_v62 }
 0x3fa   : > { %v1347_v38 = vmul.f32 %v1331_v58, %v1283_v31 }
 0x3fb   : > { %v1254_v63 = vpop.f32.mrf.mxu1 }
 0x3fc   : > { %v1284_v9 = vadd.f32 %v1254_v63, %v3300_v26  ;;  %1485 = vmatmul.f32.gmra.mxu2 %v1425_v13  ;;  %v1363_v30 = vadd.f32 %v1347_v38, %v1283_v31  ;;  %v1299_v26 = vmul.f32 0.5, %v1283_v31 }
 0x3fe   : > { %v2428_v41 = vpop.eup %2427  ;;  %v1379_v28 = vmul.f32 0.7978846, %v1363_v30  ;;  %v1316_v16 = vmul.f32 0.044715, %v1284_v9 }
 0x3ff   : > { %v1410_v18 = vadd.f32 1.0, %v2428_v41 }
 0x400   : > { %2429 = vtanh.f32 %v1379_v28  ;;  %v1332_v21 = vmul.f32 %v1316_v16, %v1284_v9 }
 0x401   : > { %v1426_v23 = vmul.f32 %v1410_v18, %v1298_v43 }
 0x402   : > { %v1348_v12 = vmul.f32 %v1332_v21, %v1284_v9 }
 0x403   : > { %v1257_v33 = vpop.f32.mrf.mxu1 }
 0x404   : > { %v1285_v25 = vadd.f32 %v1257_v33, %v3303_v17  ;;  %1488 = vmatmul.f32.gmra.mxu2 %v1426_v23  ;;  %v1364_v27 = vadd.f32 %v1348_v12, %v1284_v9  ;;  %v1300_v17 = vmul.f32 0.5, %v1284_v9 }
 0x406   : > { %v2430_v60 = vpop.eup %2429  ;;  %v1380_v29 = vmul.f32 0.7978846, %v1364_v27  ;;  %v1317_v4 = vmul.f32 0.044715, %v1285_v25 }
 0x407   : > { %v1411_v11 = vadd.f32 1.0, %v2430_v60 }
 0x408   : > { %2431 = vtanh.f32 %v1380_v29  ;;  %v1333_v14 = vmul.f32 %v1317_v4, %v1285_v25 }
 0x409   : > { %v1427_v15 = vmul.f32 %v1411_v11, %v1299_v26 }
 0x40a   : > { %v1349_v45 = vmul.f32 %v1333_v14, %v1285_v25 }
 0x40b   : > { %v1260_v5 = vpop.f32.mrf.mxu1 }
 0x40c   : > { %v1286_v44 = vadd.f32 %v1260_v5, %v3306_v19  ;;  %1491 = vmatmul.f32.gmra.mxu2 %v1427_v15  ;;  %v1365_v46 = vadd.f32 %v1349_v45, %v1285_v25  ;;  %v1301_v19 = vmul.f32 0.5, %v1285_v25 }
 0x40e   : > { %v2432_v47 = vpop.eup %2431  ;;  %v1318_v35 = vmul.f32 0.044715, %v1286_v44  ;;  %v1381_v48 = vmul.f32 0.7978846, %v1365_v46 }
 0x40f   : > { %v1412_v49 = vadd.f32 1.0, %v2432_v47 }
 0x410   : > { %2433 = vtanh.f32 %v1381_v48  ;;  %v1334_v3 = vmul.f32 %v1318_v35, %v1286_v44 }
 0x411   : > { %v1428_v24 = vmul.f32 %v1412_v49, %v1300_v17 }
 0x412   : > { %v1350_v50 = vmul.f32 %v1334_v3, %v1286_v44 }
 0x413   : > { %v1263_v51 = vpop.f32.mrf.mxu1 }
 0x414   : > { %v1287_v40 = vadd.f32 %v1263_v51, %v3309_v20  ;;  %1494 = vmatmul.f32.gmra.mxu2 %v1428_v24  ;;  %v1366_v7 = vadd.f32 %v1350_v50, %v1286_v44  ;;  %v1302_v20 = vmul.f32 0.5, %v1286_v44 }
 0x416   : > { %v2434_v39 = vpop.eup %2433  ;;  %v1319_v52 = vmul.f32 0.044715, %v1287_v40  ;;  %v1382_v2 = vmul.f32 0.7978846, %v1366_v7 }
 0x417   : > { %v1413_v34 = vadd.f32 1.0, %v2434_v39 }
 0x418   : > { %2435 = vtanh.f32 %v1382_v2  ;;  %v1335_v53 = vmul.f32 %v1319_v52, %v1287_v40 }
 0x419   : > { %v1429_v55 = vmul.f32 %v1413_v34, %v1301_v19 }
 0x41a   : > { %v1351_v42 = vmul.f32 %v1335_v53, %v1287_v40 }
 0x41b   : > { %v1266_v6 = vpop.f32.mrf.mxu1 }
 0x41c   : > { %v1288_v37 = vadd.f32 %v1266_v6, %v3313_v10  ;;  %1497 = vmatmul.f32.gmra.mxu2 %v1429_v55  ;;  %v1367_v1 = vadd.f32 %v1351_v42, %v1287_v40  ;;  %v1303_v10 = vmul.f32 0.5, %v1287_v40 }
 0x41e   : > { %v2436_v32 = vpop.eup %2435  ;;  %v1320_v54 = vmul.f32 0.044715, %v1288_v37  ;;  %v1383_v57 = vmul.f32 0.7978846, %v1367_v1 }
 0x41f   : > { %v1414_v31 = vadd.f32 1.0, %v2436_v32 }
 0x420   : > { %2437 = vtanh.f32 %v1383_v57  ;;  %v1336_v59 = vmul.f32 %v1320_v54, %v1288_v37 }
 0x421   : > { %v1430_v56 = vmul.f32 %v1414_v31, %v1302_v20 }
 0x422   : > { %v1352_v22 = vmul.f32 %v1336_v59, %v1288_v37 }
 0x423   : > { %v1269_v0 = vpop.f32.mrf.mxu1 }
 0x424   : > { %v1289_v62 = vadd.f32 %v1269_v0, %v3315_v61  ;;  %1500 = vmatmul.f32.gmra.mxu2 %v1430_v56  ;;  %v1368_v8 = vadd.f32 %v1352_v22, %v1288_v37  ;;  %v1304_v61 = vmul.f32 0.5, %v1288_v37 }
 0x426   : > { %v2438_v58 = vpop.eup %2437  ;;  %v1321_v13 = vmul.f32 0.044715, %v1289_v62  ;;  %v1384_v38 = vmul.f32 0.7978846, %v1368_v8  ;;  %v1305_v26 = vmul.f32 0.5, %v1289_v62 }
 0x427   : > { %v1415_v63 = vadd.f32 1.0, %v2438_v58 }
 0x428   : > { %2439 = vtanh.f32 %v1384_v38  ;;  %v1337_v9 = vmul.f32 %v1321_v13, %v1289_v62 }
 0x429   : > { %v1431_v30 = vmul.f32 %v1415_v63, %v1303_v10 }
 0x42a   : > { %v1353_v41 = vmul.f32 %v1337_v9, %v1289_v62 }
 0x42b   : > { %v1272_v28 = vpop.f32.mrf.mxu1 }
 0x42c   : > { %v1290_v16 = vadd.f32 %v1272_v28, %v3317_v36  ;;  %1503 = vmatmul.f32.gmra.mxu2 %v1431_v30  ;;  %v1369_v43 = vadd.f32 %v1353_v41, %v1289_v62 }
 0x42e   : > { %v2440_v18 = vpop.eup %2439  ;;  %v1322_v21 = vmul.f32 0.044715, %v1290_v16  ;;  %v1385_v23 = vmul.f32 0.7978846, %v1369_v43  ;;  %v1306_v15 = vmul.f32 0.5, %v1290_v16 }
 0x42f   : > { %v1416_v12 = vadd.f32 1.0, %v2440_v18 }
 0x430   : > { %2441 = vtanh.f32 %v1385_v23  ;;  %v1338_v33 = vmul.f32 %v1322_v21, %v1290_v16 }
 0x431   : > { %v1432_v25 = vmul.f32 %v1416_v12, %v1304_v61 }
 0x432   : > { %v1354_v27 = vmul.f32 %v1338_v33, %v1290_v16 }
 0x434   : > { %1506 = vmatmul.f32.gmra.mxu2 %v1432_v25  ;;  %v1370_v60 = vadd.f32 %v1354_v27, %v1290_v16 }
 0x436   : > { %v2442_v29 = vpop.eup %2441  ;;  %v1386_v4 = vmul.f32 0.7978846, %v1370_v60 }
 0x437   : > { %v1417_v11 = vadd.f32 1.0, %v2442_v29 }
 0x438   : > { %2443 = vtanh.f32 %v1386_v4 }
 0x439   : > { %v1433_v14 = vmul.f32 %v1417_v11, %v1305_v26 }
 0x43c   : > { %1509 = vmatmul.f32.gmra.mxu2 %v1433_v14 }
 0x43e   : > { %v2444_v36 = vpop.eup %2443 }
 0x43f   : > { %v1418_v45 = vadd.f32 1.0, %v2444_v36 }
 0x441   : > { %v1434_v5 = vmul.f32 %v1418_v45, %v1306_v15 }
 0x444   : > { %1512 = vmatmul.f32.gmra.mxu2 %v1434_v5 }
 0x467   : > { %v3335_v44 = vpop.f32.mrf.mxu2 }
 0x468   : > { %v1535_v45 = vmul.f32 0.044715, %v3335_v44 }
 0x46f   : > { %v3337_v46 = vpop.f32.mrf.mxu2 }
 0x470   : > { %v1536_v6 = vmul.f32 0.044715, %v3337_v46 }
 0x472   : > { %v1552_v54 = vmul.f32 %v1536_v6, %v3337_v46  ;;  %v1551_v6 = vmul.f32 %v1535_v45, %v3335_v44 }
 0x474   : > { %v1568_v62 = vmul.f32 %v1552_v54, %v3337_v46 }
 0x476   : > { %v1584_v30 = vadd.f32 %v1568_v62, %v3337_v46 }
 0x477   : > { %v3339_v47 = vpop.f32.mrf.mxu2 }
 0x478   : > { %v1537_v23 = vmul.f32 0.044715, %v3339_v47  ;;  %v1600_v12 = vmul.f32 0.7978846, %v1584_v30 }
 0x47a   : > { %v1553_v4 = vmul.f32 %v1537_v23, %v3339_v47 }
 0x47f   : > { %v3341_v35 = vpop.f32.mrf.mxu2 }
 0x487   : > { %v3343_v48 = vpop.f32.mrf.mxu2 }
 0x488   : > { %v1539_v7 = vmul.f32 0.044715, %v3343_v48 }
 0x48a   : > { %v1555_v19 = vmul.f32 %v1539_v7, %v3343_v48 }
 0x48c   : > { %v1571_v32 = vmul.f32 %v1555_v19, %v3343_v48 }
 0x48e   : > { %v1587_v20 = vadd.f32 %v1571_v32, %v3343_v48 }
 0x48f   : > { %v3345_v17 = vpop.f32.mrf.mxu2 }
 0x490   : > { %v1540_v8 = vmul.f32 0.044715, %v3345_v17  ;;  %v1603_v13 = vmul.f32 0.7978846, %v1587_v20 }
 0x492   : > { %v1556_v41 = vmul.f32 %v1540_v8, %v3345_v17 }
 0x494   : > { %v1572_v27 = vmul.f32 %v1556_v41, %v3345_v17  ;;  %v1524_v41 = vmul.f32 0.5, %v3345_v17 }
 0x496   : > { %v1588_v11 = vadd.f32 %v1572_v27, %v3345_v17 }
 0x497   : > { %v3347_v49 = vpop.f32.mrf.mxu2 }
 0x49f   : > { %v1498_v3 = vpop.f32.mrf.mxu2 }
 0x4a0   : > { %v1542_v24 = vmul.f32 0.044715, %v1498_v3  ;;  %v1526_v61 = vmul.f32 0.5, %v1498_v3 }
 0x4a2   : > { %v1558_v50 = vmul.f32 %v1542_v24, %v1498_v3 }
 0x4a4   : > { %v1574_v52 = vmul.f32 %v1558_v50, %v1498_v3 }
 0x4a6   : > { %v1590_v53 = vadd.f32 %v1574_v52, %v1498_v3  ;;  %v1523_v3 = vmul.f32 0.5, %v3343_v48 }
 0x4a7   : > { %v1501_v51 = vpop.f32.mrf.mxu2 }
 0x4a8   : > { %v1543_v40 = vmul.f32 0.044715, %v1501_v51  ;;  %v1606_v1 = vmul.f32 0.7978846, %v1590_v53  ;;  %v1527_v22 = vmul.f32 0.5, %v1501_v51 }
 0x4aa   : > { %v1559_v39 = vmul.f32 %v1543_v40, %v1501_v51  ;;  %v1541_v40 = vmul.f32 0.044715, %v3347_v49 }
 0x4ac   : > { %v1575_v2 = vmul.f32 %v1559_v39, %v1501_v51  ;;  %v1604_v39 = vmul.f32 0.7978846, %v1588_v11 }
 0x4ae   : > { %v1591_v34 = vadd.f32 %v1575_v2, %v1501_v51  ;;  %v1569_v51 = vmul.f32 %v1553_v4, %v3339_v47  ;;  %v1521_v4 = vmul.f32 0.5, %v3339_v47 }
 0x4af   : > { %v3351_v55 = vpop.f32.mrf.mxu2 }
 0x4b0   : > { %v1607_v42 = vmul.f32 0.7978846, %v1591_v34  ;;  %v1544_v37 = vmul.f32 0.044715, %v3351_v55  ;;  %v1585_v48 = vadd.f32 %v1569_v51, %v3339_v47  ;;  %v1525_v47 = vmul.f32 0.5, %v3347_v49 }
 0x4b2   : > { %2445 = vtanh.f32 %v1607_v42  ;;  %v1560_v57 = vmul.f32 %v1544_v37, %v3351_v55  ;;  %v1557_v37 = vmul.f32 %v1541_v40, %v3347_v49 }
 0x4b3   : > { %2447 = vtanh.f32 %v1606_v1 }
 0x4b4   : > { %v1576_v38 = vmul.f32 %v1560_v57, %v3351_v55  ;;  %2449 = vtanh.f32 %v1603_v13  ;;  %v1573_v8 = vmul.f32 %v1557_v37, %v3347_v49 }
 0x4b6   : > { %v1592_v16 = vadd.f32 %v1576_v38, %v3351_v55 }
 0x4b7   : > { %v1507_v31 = vpop.f32.mrf.mxu2 }
 0x4b8   : > { %v2446_v59 = vpop.eup %2445  ;;  %v1545_v56 = vmul.f32 0.044715, %v1507_v31  ;;  %v1608_v25 = vmul.f32 0.7978846, %v1592_v16  ;;  %v1529_v24 = vmul.f32 0.5, %v1507_v31 }
 0x4b9   : > { %v1639_v0 = vadd.f32 1.0, %v2446_v59  ;;  %v2448_v63 = vpop.eup %2447  ;;  %v1528_v59 = vmul.f32 0.5, %v3351_v55 }
 0x4ba   : > { %v1561_v58 = vmul.f32 %v1545_v56, %v1507_v31  ;;  %v1638_v18 = vadd.f32 1.0, %v2448_v63  ;;  %v2450_v29 = vpop.eup %2449  ;;  %v1601_v56 = vmul.f32 0.7978846, %v1585_v48  ;;  %v1589_v63 = vadd.f32 %v1573_v8, %v3347_v49 }
 0x4bb   : > { %v3362_v10 = vmul.f32 %v1639_v0, %v1527_v22  ;;  %v1635_v36 = vadd.f32 1.0, %v2450_v29  ;;  %v1567_v22 = vmul.f32 %v1551_v6, %v3335_v44  ;;  %v1538_v0 = vmul.f32 0.044715, %v3341_v35 }
 0x4bc   : > { %v1577_v9 = vmul.f32 %v1561_v58, %v1507_v31  ;;  %v3373_v60 = vmul.f32 %v1638_v18, %v1526_v61 }
 0x4bd   : > { %1684 = vadd.xlane.f32.xlu2 %v3362_v10  ;;  %v3384_v19 = vmul.f32 %v1635_v36, %v1523_v3  ;;  %v1554_v55 = vmul.f32 %v1538_v0, %v3341_v35 }
 0x4be   : > { %v1593_v28 = vadd.f32 %v1577_v9, %v1507_v31  ;;  %v1520_v31 = vmul.f32 0.5, %v3337_v46  ;;  %v1583_v46 = vadd.f32 %v1567_v22, %v3335_v44 }
 0x4bf   : > { %v3368_v43 = vpop.f32.mrf.mxu2  ;;  %v1570_v23 = vmul.f32 %v1554_v55, %v3341_v35 }
 0x4c0   : > { %v1609_v21 = vmul.f32 0.7978846, %v1593_v28  ;;  %v1546_v33 = vmul.f32 0.044715, %v3368_v43  ;;  %v1599_v18 = vmul.f32 0.7978846, %v1583_v46 }
 0x4c1   : > { %v1586_v17 = vadd.f32 %v1570_v23, %v3341_v35 }
 0x4c2   : > { %2451 = vtanh.f32 %v1609_v21  ;;  %v1562_v26 = vmul.f32 %v1546_v33, %v3368_v43  ;;  %v1605_v21 = vmul.f32 0.7978846, %v1589_v63 }
 0x4c3   : > { %2453 = vtanh.f32 %v1600_v12  ;;  %v1602_v11 = vmul.f32 0.7978846, %v1586_v17 }
 0x4c4   : > { %2455 = vtanh.f32 %v1608_v25  ;;  %v1578_v52 = vmul.f32 %v1562_v26, %v3368_v43  ;;  %v1530_v26 = vmul.f32 0.5, %v3368_v43 }
 0x4c5   : > { %1682 = vadd.xlane.f32.xlu2 %v3373_v60  ;;  %2457 = vtanh.f32 %v1604_v39 }
 0x4c6   : > { %v1594_v32 = vadd.f32 %v1578_v52, %v3368_v43  ;;  %v1468_v52 = vpop.f32.mrf.mxu0 }
 0x4c7   : > { %v1513_v14 = vpop.f32.mrf.mxu2  ;;  %v1532_v49 = vmul.f32 0.044715, %v1468_v52 }
 0x4c8   : > { %v2452_v15 = vpop.eup %2451  ;;  %v1547_v5 = vmul.f32 0.044715, %v1513_v14  ;;  %v1610_v62 = vmul.f32 0.7978846, %v1594_v32  ;;  %v1531_v28 = vmul.f32 0.5, %v1513_v14 }
 0x4c9   : > { %v1641_v50 = vadd.f32 1.0, %v2452_v15  ;;  %v2454_v2 = vpop.eup %2453 }
 0x4ca   : > { %v1563_v7 = vmul.f32 %v1547_v5, %v1513_v14  ;;  %v2456_v53 = vpop.eup %2455  ;;  %v1632_v54 = vadd.f32 1.0, %v2454_v2 }
 0x4cb   : > { %v3386_v34 = vmul.f32 %v1641_v50, %v1529_v24  ;;  %v1640_v57 = vadd.f32 1.0, %v2456_v53  ;;  %v2458_v38 = vpop.eup %2457  ;;  %v1519_v24 = vmul.f32 0.5, %v3335_v44  ;;  %v2717_v44 = vmov 128.0  }
 0x4cc   : > { %v1579_v42 = vmul.f32 %v1563_v7, %v1513_v14  ;;  %v3399_v58 = vmul.f32 %v1632_v54, %v1520_v31  ;;  %v1636_v9 = vadd.f32 1.0, %v2458_v38  ;;  %v1522_v7 = vmul.f32 0.5, %v3341_v35 }
 0x4cd   : > { %1676 = vadd.xlane.f32.xlu2 %v3384_v19  ;;  %1688 = vadd.xlane.f32.xlu1 %v3386_v34  ;;  %v3401_v13 = vmul.f32 %v1640_v57, %v1528_v59 }
 0x4ce   : > { %v1595_v1 = vadd.f32 %v1579_v42, %v1513_v14  ;;  %v3410_v12 = vmul.f32 %v1636_v9, %v1524_v41  ;;  %v1471_v53 = vpop.f32.mrf.mxu0  ;;  %v1548_v42 = vmul.f32 %v1532_v49, %v1468_v52 }
 0x4d0   : > { %v1611_v20 = vmul.f32 0.7978846, %v1595_v1  ;;  %v1564_v37 = vmul.f32 %v1548_v42, %v1468_v52 }
 0x4d2   : > { %2459 = vtanh.f32 %v1611_v20  ;;  %v1580_v32 = vadd.f32 %v1564_v37, %v1468_v52 }
 0x4d3   : > { %2461 = vtanh.f32 %v1601_v56 }
 0x4d4   : > { %2463 = vtanh.f32 %v1610_v62  ;;  %v1596_v35 = vmul.f32 0.7978846, %v1580_v32  ;;  %v1533_v62 = vmul.f32 0.044715, %v1471_v53 }
 0x4d5   : > { %1670 = vadd.xlane.f32.xlu2 %v3399_v58  ;;  %1686 = vadd.xlane.f32.xlu1 %v3401_v13  ;;  %2465 = vtanh.f32 %v1599_v18 }
 0x4d6   : > { %2467 = vtanh.f32 %v1605_v21  ;;  %v1474_v54 = vpop.f32.mrf.mxu0  ;;  %v1549_v55 = vmul.f32 %v1533_v62, %v1471_v53 }
 0x4d7   : > { %2469 = vtanh.f32 %v1602_v11  ;;  %v1534_v57 = vmul.f32 0.044715, %v1474_v54 }
 0x4d8   : > { %v2460_v30 = vpop.eup %2459  ;;  %2471 = vrcp.f32 %v2717_v44 }
 0x4d9   : > { %v1643_v16 = vadd.f32 1.0, %v2460_v30  ;;  %v2462_v61 = vpop.eup %2461  ;;  %v1550_v31 = vmul.f32 %v1534_v57, %v1474_v54  ;;  %2473 = vtanh.f32 %v1596_v35  ;;  %v1516_v30 = vmul.f32 0.5, %v1468_v52 }
 0x4da   : > { %v2464_v25 = vpop.eup %2463  ;;  %v1633_v27 = vadd.f32 1.0, %v2462_v61 }
 0x4db   : > { %v3412_v33 = vmul.f32 %v1643_v16, %v1531_v28  ;;  %v1642_v29 = vadd.f32 1.0, %v2464_v25  ;;  %v2466_v14 = vpop.eup %2465  ;;  %v1566_v8 = vmul.f32 %v1550_v31, %v1474_v54  ;;  %v1565_v16 = vmul.f32 %v1549_v55, %v1471_v53 }
 0x4dc   : > { %v3419_v36 = vmul.f32 %v1633_v27, %v1521_v4  ;;  %v2468_v45 = vpop.eup %2467  ;;  %v1631_v5 = vadd.f32 1.0, %v2466_v14 }
 0x4dd   : > { %1678 = vadd.xlane.f32.xlu1 %v3410_v12  ;;  %1692 = vadd.xlane.f32.xlu0 %v3412_v33  ;;  %v3421_v15 = vmul.f32 %v1642_v29, %v1530_v26  ;;  %v1637_v3 = vadd.f32 1.0, %v2468_v45  ;;  %v2470_v51 = vpop.eup %2469  ;;  %v1582_v63 = vadd.f32 %v1566_v8, %v1474_v54  ;;  %v1581_v21 = vadd.f32 %v1565_v16, %v1471_v53 }
 0x4de   : > { %v3427_v50 = vmul.f32 %v1631_v5, %v1519_v24  ;;  %v1634_v40 = vadd.f32 1.0, %v2470_v51  ;;  %v2472_v2 = vpop.eup %2471  ;;  %v1518_v5 = vmul.f32 0.5, %v1474_v54 }
 0x4df   : > { %v3429_v43 = vmul.f32 %v1637_v3, %v1525_v47  ;;  %v1695_v6 = vmul.f32 128.0, %v2472_v2  ;;  %vm1699_vm0 = vweird.f32 %v2472_v2  ;;  %v2474_v46 = vpop.eup %2473  ;;  %v1598_v28 = vmul.f32 0.7978846, %v1582_v63 }
 0x4e0   : > { %v3434_v39 = vmul.f32 %v1634_v40, %v1522_v7  ;;  %v1628_v9 = vadd.f32 1.0, %v2474_v46  ;;  %v1597_v25 = vmul.f32 0.7978846, %v1581_v21 }
 0x4e1   : > { %v1696_v48 = vsub.f32 1.0, %v1695_v6  ;;  %2475 = vtanh.f32 %v1598_v28 }
 0x4e2   : > { %v3445_v18 = vmul.f32 %v1628_v9, %v1516_v30  ;;  %2477 = vtanh.f32 %v1597_v25 }
 0x4e3   : > { %v1697_v1 = vmul.f32 %v2472_v2, %v1696_v48 }
 0x4e5   : > { %1672 = vadd.xlane.f32.xlu1 %v3419_v36  ;;  %1690 = vadd.xlane.f32.xlu0 %v3421_v15  ;;  %v1698_v20 = vadd.f32 %v2472_v2, %v1697_v1 }
 0x4e7   : > { %v3437_v59 = vsel %vm1699_vm0, %v2472_v2, %v1698_v20  ;;  %v2476_v29 = vpop.eup %2475  ;;  %v1517_v2 = vmul.f32 0.5, %v1471_v53 }
 0x4e8   : > { %v1630_v14 = vadd.f32 1.0, %v2476_v29  ;;  %v2478_v24 = vpop.eup %2477 }
 0x4e9   : > { %v1629_v44 = vadd.f32 1.0, %v2478_v24 }
 0x4ea   : > { %v3460_v3 = vmul.f32 %v1630_v14, %v1518_v5 }
 0x4eb   : > { %v3474_v48 = vmul.f32 %v1629_v44, %v1517_v2 }
 0x4ed   : > { %1668 = vadd.xlane.f32.xlu1 %v3427_v50  ;;  %1680 = vadd.xlane.f32.xlu0 %v3429_v43 }
 0x4f5   : > { %1674 = vadd.xlane.f32.xlu0 %v3434_v39 }
 0x530   : > { %v1685_v17 = vpop.xlane.xlu2 %1684 }
 0x531   : > { %v1712_v42 = vmul.f32 %v3437_v59, %v1685_v17 }
 0x538   : > { %v1683_v51 = vpop.xlane.xlu2 %1682 }
 0x539   : > { %v1711_v37 = vmul.f32 %v3437_v59, %v1683_v51 }
 0x53b   : > { %v3485_v54 = vsub.f32 %v3373_v60, %v1711_v37 }
 0x53d   : > { %v1743_v60 = vmul.f32 %v3485_v54, %v3485_v54 }
 0x540   : > { %v1689_v56 = vpop.xlane.xlu1 %1688  ;;  %v1677_v53 = vpop.xlane.xlu2 %1676 }
 0x541   : > { %v1714_v22 = vmul.f32 %v3437_v59, %v1689_v56 }
 0x543   : > { %v3441_v0 = vsub.f32 %v3386_v34, %v1714_v22  ;;  %v1708_v22 = vmul.f32 %v3437_v59, %v1677_v53 }
 0x545   : > { %v1746_v38 = vmul.f32 %v3441_v0, %v3441_v0  ;;  %v3506_v8 = vsub.f32 %v3384_v19, %v1708_v22 }
 0x547   : > { %1775 = vadd.xlane.f32.xlu1 %v1746_v38 }
 0x548   : > { %v1687_v41 = vpop.xlane.xlu1 %1686  ;;  %v1671_v38 = vpop.xlane.xlu2 %1670 }
 0x549   : > { %v1713_v47 = vmul.f32 %v3437_v59, %v1687_v41  ;;  %v1705_v9 = vmul.f32 %v3437_v59, %v1671_v38 }
 0x54f   : > { %1662 = vadd.xlane.f32.xlu1 %v3445_v18 }
 0x550   : > { %v1693_v34 = vpop.xlane.xlu0 %1692  ;;  %v1679_v4 = vpop.xlane.xlu1 %1678 }
 0x551   : > { %v1716_v23 = vmul.f32 %v3437_v59, %v1693_v34  ;;  %v1709_v35 = vmul.f32 %v3437_v59, %v1679_v4 }
 0x553   : > { %v3450_v61 = vsub.f32 %v3412_v33, %v1716_v23 }
 0x555   : > { %v1748_v27 = vmul.f32 %v3450_v61, %v3450_v61 }
 0x557   : > { %1779 = vadd.xlane.f32.xlu0 %v1748_v27 }
 0x558   : > { %v1691_v26 = vpop.xlane.xlu0 %1690  ;;  %v1673_v40 = vpop.xlane.xlu1 %1672 }
 0x559   : > { %v1715_v11 = vmul.f32 %v3437_v59, %v1691_v26  ;;  %v1706_v46 = vmul.f32 %v3437_v59, %v1673_v40 }
 0x55b   : > { %v3456_v45 = vsub.f32 %v3421_v15, %v1715_v11  ;;  %v3466_v15 = vsub.f32 %v3401_v13, %v1713_v47  ;;  %v3517_v19 = vsub.f32 %v3419_v36, %v1706_v46 }
 0x55d   : > { %v1747_v33 = vmul.f32 %v3456_v45, %v3456_v45  ;;  %v1745_v1 = vmul.f32 %v3466_v15, %v3466_v15  ;;  %v1738_v30 = vmul.f32 %v3517_v19, %v3517_v19 }
 0x55f   : > { %1777 = vadd.xlane.f32.xlu2 %v1747_v33  ;;  %1666 = vadd.xlane.f32.xlu0 %v3460_v3 }
 0x560   : > { %v1681_v7 = vpop.xlane.xlu0 %1680  ;;  %v1669_v57 = vpop.xlane.xlu1 %1668 }
 0x561   : > { %v1710_v52 = vmul.f32 %v3437_v59, %v1681_v7  ;;  %v1704_v31 = vmul.f32 %v3437_v59, %v1669_v57 }
 0x563   : > { %v3469_v49 = vsub.f32 %v3429_v43, %v1710_v52  ;;  %v3481_v43 = vsub.f32 %v3362_v10, %v1712_v42  ;;  %v3503_v62 = vsub.f32 %v3427_v50, %v1704_v31  ;;  %v3520_v50 = vsub.f32 %v3399_v58, %v1705_v9 }
 0x565   : > { %v1742_v6 = vmul.f32 %v3469_v49, %v3469_v49  ;;  %v1744_v10 = vmul.f32 %v3481_v43, %v3481_v43  ;;  %v1736_v55 = vmul.f32 %v3503_v62, %v3503_v62  ;;  %v1737_v41 = vmul.f32 %v3520_v50, %v3520_v50 }
 0x567   : > { %1767 = vadd.xlane.f32.xlu1 %v1742_v6  ;;  %1664 = vadd.xlane.f32.xlu2 %v3474_v48 }
 0x568   : > { %1773 = vadd.xlane.f32.xlu0 %v1745_v1  ;;  %v1675_v13 = vpop.xlane.xlu0 %1674 }
 0x569   : > { %v1707_v32 = vmul.f32 %v3437_v59, %v1675_v13 }
 0x56b   : > { %v3488_v20 = vsub.f32 %v3434_v39, %v1707_v32  ;;  %v3500_v39 = vsub.f32 %v3410_v12, %v1709_v35  ;;  %v1740_v12 = vmul.f32 %v3506_v8, %v3506_v8 }
 0x56d   : > { %v1739_v56 = vmul.f32 %v3488_v20, %v3488_v20  ;;  %v1741_v63 = vmul.f32 %v3500_v39, %v3500_v39 }
 0x56f   : > { %1761 = vadd.xlane.f32.xlu1 %v1739_v56  ;;  %1771 = vadd.xlane.f32.xlu2 %v1744_v10 }
 0x570   : > { %1769 = vadd.xlane.f32.xlu0 %v1743_v60 }
 0x577   : > { %1755 = vadd.xlane.f32.xlu1 %v1736_v55  ;;  %1765 = vadd.xlane.f32.xlu2 %v1741_v63  ;;  %v3565_v55 = vld [vmem:[%s3770_s4] ss:$0 sm:$0xff] }
 0x578   : > { %1763 = vadd.xlane.f32.xlu0 %v1740_v12 }
 0x57f   : > { %1759 = vadd.xlane.f32.xlu2 %v1738_v30 }
 0x580   : > { %1757 = vadd.xlane.f32.xlu0 %v1737_v41 }
 0x5ba   : > { %v1776_v28 = vpop.xlane.xlu1 %1775 }
 0x5bb   : > { %v1794_v16 = vmul.f32 %v1776_v28, %v3437_v59 }
 0x5bd   : > { %v1810_v23 = vadd.f32 1e-05, %v1794_v16 }
 0x5bf   : > { %2479 = vrsqrt.f32 %v1810_v23  ;;  %vm1949_vm5 = vweird.f32 %v1810_v23 }
 0x5c2   : > { %v1663_v34 = vpop.xlane.xlu1 %1662 }
 0x5c3   : > { %v1701_v21 = vmul.f32 %v3437_v59, %v1663_v34 }
 0x5c5   : > { %v3529_v36 = vsub.f32 %v3445_v18, %v1701_v21  ;;  %v3534_v29 = vpop.eup %2479 }
 0x5c6   : > { %v1944_v4 = vmul.f32 %v3534_v29, %v1810_v23  ;;  %vm1950_vm4 = vweird.f32 %v3534_v29 }
 0x5c7   : > { %v1733_v58 = vmul.f32 %v3529_v36, %v3529_v36  ;;  %vm3575_vm6 = vmor %vm1949_vm5, %vm1950_vm4 }
 0x5c8   : > { %v1945_v33 = vmul.f32 %v3534_v29, %v1944_v4 }
 0x5c9   : > { %1749 = vadd.xlane.f32.xlu1 %v1733_v58 }
 0x5ca   : > { %v1780_v25 = vpop.xlane.xlu0 %1779  ;;  %v1946_v52 = vmul.f32 0.5, %v1945_v33 }
 0x5cb   : > { %v1796_v17 = vmul.f32 %v1780_v25, %v3437_v59 }
 0x5cc   : > { %v1947_v32 = vsub.f32 1.5, %v1946_v52 }
 0x5cd   : > { %v1812_v27 = vadd.f32 1e-05, %v1796_v17 }
 0x5ce   : > { %v1948_v46 = vmul.f32 %v3534_v29, %v1947_v32 }
 0x5cf   : > { %2481 = vrsqrt.f32 %v1812_v27  ;;  %vm1969_vm2 = vweird.f32 %v1812_v27 }
 0x5d0   : > { %v1952_v25 = vsel %vm3575_vm6, %v3534_v29, %v1948_v46 }
 0x5d1   : > { %v1986_v33 = vmul.f32 %v1952_v25, %v3441_v0 }
 0x5d2   : > { %v1778_v26 = vpop.xlane.xlu2 %1777  ;;  %v1667_v11 = vpop.xlane.xlu0 %1666 }
 0x5d3   : > { %v1795_v14 = vmul.f32 %v1778_v26, %v3437_v59  ;;  %v1703_v18 = vmul.f32 %v3437_v59, %v1667_v11 }
 0x5d5   : > { %v2482_v5 = vpop.eup %2481  ;;  %v1811_v24 = vadd.f32 1e-05, %v1795_v14  ;;  %v3541_v47 = vsub.f32 %v3460_v3, %v1703_v18 }
 0x5d6   : > { %v1964_v51 = vmul.f32 %v2482_v5, %v1812_v27  ;;  %vm1970_vm1 = vweird.f32 %v2482_v5 }
 0x5d7   : > { %2483 = vrsqrt.f32 %v1811_v24  ;;  %v1735_v40 = vmul.f32 %v3541_v47, %v3541_v47  ;;  %vm1971_vm3 = vmor %vm1969_vm2, %vm1970_vm1  ;;  %vm1959_vm8 = vweird.f32 %v1811_v24 }
 0x5d8   : > { %v1965_v7 = vmul.f32 %v2482_v5, %v1964_v51 }
 0x5d9   : > { %1753 = vadd.xlane.f32.xlu2 %v1735_v40 }
 0x5da   : > { %v1966_v44 = vmul.f32 0.5, %v1965_v7  ;;  %v1768_v2 = vpop.xlane.xlu1 %1767  ;;  %v1665_v42 = vpop.xlane.xlu2 %1664 }
 0x5db   : > { %v1790_v6 = vmul.f32 %v1768_v2, %v3437_v59  ;;  %v1702_v37 = vmul.f32 %v3437_v59, %v1665_v42  ;;  %v1774_v1 = vpop.xlane.xlu0 %1773 }
 0x5dc   : > { %v1967_v13 = vsub.f32 1.5, %v1966_v44  ;;  %v1793_v3 = vmul.f32 %v1774_v1, %v3437_v59  ;;  %v2005_v1 = vmul.f32 %v3565_v55, %v1986_v33 }
 0x5dd   : > { %v2484_v53 = vpop.eup %2483  ;;  %v3548_v57 = vadd.f32 1e-05, %v1790_v6  ;;  %v3551_v35 = vsub.f32 %v3474_v48, %v1702_v37 }
 0x5de   : > { %v1968_v31 = vmul.f32 %v2482_v5, %v1967_v13  ;;  %v1954_v56 = vmul.f32 %v2484_v53, %v1811_v24  ;;  %v3553_v10 = vadd.f32 1e-05, %v1793_v3  ;;  %vm1960_vm7 = vweird.f32 %v2484_v53 }
 0x5df   : > { %2485 = vrsqrt.f32 %v3548_v57  ;;  %v1734_v22 = vmul.f32 %v3551_v35, %v3551_v35  ;;  %vm1961_vm9 = vmor %vm1959_vm8, %vm1960_vm7 }
 0x5e0   : > { %v1972_v60 = vsel %vm1971_vm3, %v2482_v5, %v1968_v31  ;;  %v1955_v38 = vmul.f32 %v2484_v53, %v1954_v56  ;;  %2487 = vrsqrt.f32 %v3553_v10  ;;  %vm1939_vm11 = vweird.f32 %v3553_v10 }
 0x5e1   : > { %v1988_v48 = vmul.f32 %v1972_v60, %v3450_v61  ;;  %1751 = vadd.xlane.f32.xlu0 %v1734_v22  ;;  %v3573_v61 = vld [vmem:[%s3771_s5] ss:$0 sm:$0xff]  ;;  %vm1909_vm3 = vweird.f32 %v3548_v57 }
 0x5e2   : > { %v1956_v63 = vmul.f32 0.5, %v1955_v38  ;;  %v1762_v9 = vpop.xlane.xlu1 %1761  ;;  %v1772_v12 = vpop.xlane.xlu2 %1771 }
 0x5e3   : > { %v1787_v30 = vmul.f32 %v1762_v9, %v3437_v59  ;;  %v1792_v41 = vmul.f32 %v1772_v12, %v3437_v59  ;;  %v1770_v28 = vpop.xlane.xlu0 %1769  ;;  %v2007_v16 = vmul.f32 %v3565_v55, %v1988_v48  ;;  %v2024_v9 = vadd.f32 %v3573_v61, %v2005_v1 }
 0x5e4   : > { %v1957_v21 = vsub.f32 1.5, %v1956_v63  ;;  %v1791_v23 = vmul.f32 %v1770_v28, %v3437_v59 }
 0x5e5   : > { %v3580_v58 = vpop.eup %2485  ;;  %v3585_v17 = vadd.f32 1e-05, %v1787_v30  ;;  %v3587_v27 = vadd.f32 1e-05, %v1792_v41  ;;  %v2026_v4 = vadd.f32 %v3573_v61, %v2007_v16 }
 0x5e6   : > { %v2488_v26 = vpop.eup %2487  ;;  %v1958_v11 = vmul.f32 %v2484_v53, %v1957_v21  ;;  %v3590_v14 = vadd.f32 1e-05, %v1791_v23  ;;  %v1904_v29 = vmul.f32 %v3580_v58, %v3548_v57  ;;  %vm1910_vm13 = vweird.f32 %v3580_v58 }
 0x5e7   : > { %v1934_v18 = vmul.f32 %v2488_v26, %v3553_v10  ;;  %2489 = vrsqrt.f32 %v3585_v17  ;;  %2028 = vmatpush.xpose.msra.mxu3 %v2026_v4  ;;  %vm1940_vm10 = vweird.f32 %v2488_v26  ;;  %vm1929_vm14 = vweird.f32 %v3587_v27  ;;  %vm3648_vm5 = vmor %vm1909_vm3, %vm1910_vm13 }
 0x5e8   : > { %v1962_v5 = vsel %vm1961_vm9, %v2484_v53, %v1958_v11  ;;  %2491 = vrsqrt.f32 %v3587_v27  ;;  %v1905_v6 = vmul.f32 %v3580_v58, %v1904_v29  ;;  %vm1941_vm12 = vmor %vm1939_vm11, %vm1940_vm10  ;;  %vm1919_vm2 = vweird.f32 %v3590_v14 }
 0x5e9   : > { %v1935_v51 = vmul.f32 %v2488_v26, %v1934_v18  ;;  %2493 = vrsqrt.f32 %v3590_v14  ;;  %v1987_v24 = vmul.f32 %v1962_v5, %v3456_v45  ;;  %vm1879_vm13 = vweird.f32 %v3585_v17 }
 0x5ea   : > { %v1766_v40 = vpop.xlane.xlu2 %1765  ;;  %v1756_v52 = vpop.xlane.xlu1 %1755  ;;  %v1906_v38 = vmul.f32 0.5, %v1905_v6 }
 0x5eb   : > { %v1936_v7 = vmul.f32 0.5, %v1935_v51  ;;  %v1789_v44 = vmul.f32 %v1766_v40, %v3437_v59  ;;  %v1764_v2 = vpop.xlane.xlu0 %1763  ;;  %v2006_v42 = vmul.f32 %v3565_v55, %v1987_v24  ;;  %v1784_v32 = vmul.f32 %v1756_v52, %v3437_v59 }
 0x5ec   : > { %v1788_v37 = vmul.f32 %v1764_v2, %v3437_v59  ;;  %v1907_v23 = vsub.f32 1.5, %v1906_v38 }
 0x5ed   : > { %v3605_v0 = vpop.eup %2489  ;;  %v1937_v13 = vsub.f32 1.5, %v1936_v7  ;;  %v3607_v3 = vadd.f32 1e-05, %v1789_v44  ;;  %v2025_v45 = vadd.f32 %v3573_v61, %v2006_v42  ;;  %v3620_v41 = vadd.f32 1e-05, %v1784_v32 }
 0x5ee   : > { %v2492_v53 = vpop.eup %2491  ;;  %v3611_v31 = vadd.f32 1e-05, %v1788_v37  ;;  %v1874_v12 = vmul.f32 %v3605_v0, %v3585_v17  ;;  %vm1880_vm9 = vweird.f32 %v3605_v0 }
 0x5ef   : > { %v2494_v56 = vpop.eup %2493  ;;  %v1938_v22 = vmul.f32 %v2488_v26, %v1937_v13  ;;  %v1924_v60 = vmul.f32 %v2492_v53, %v3587_v27  ;;  %2029 = vmatpush.xpose.msra.mxu3 %v2025_v45  ;;  %2495 = vrsqrt.f32 %v3607_v3  ;;  %vm1930_vm15 = vweird.f32 %v2492_v53 }
 0x5f0   : > { %v1914_v46 = vmul.f32 %v2494_v56, %v3590_v14  ;;  %2497 = vrsqrt.f32 %v3611_v31  ;;  %v1875_v18 = vmul.f32 %v3605_v0, %v1874_v12  ;;  %vm1920_vm0 = vweird.f32 %v2494_v56  ;;  %vm1931_vm1 = vmor %vm1929_vm14, %vm1930_vm15 }
 0x5f1   : > { %v1942_v48 = vsel %vm1941_vm12, %v2488_v26, %v1938_v22  ;;  %v1925_v63 = vmul.f32 %v2492_v53, %v1924_v60  ;;  %2499 = vrsqrt.f32 %v3620_v41  ;;  %v1908_v27 = vmul.f32 %v3580_v58, %v1907_v23  ;;  %vm1921_vm4 = vmor %vm1919_vm2, %vm1920_vm0 }
 0x5f2   : > { %v1915_v30 = vmul.f32 %v2494_v56, %v1914_v46  ;;  %v1760_v10 = vpop.xlane.xlu2 %1759  ;;  %v1985_v21 = vmul.f32 %v1942_v48, %v3466_v15  ;;  %v1876_v2 = vmul.f32 0.5, %v1875_v18  ;;  %vm1899_vm6 = vweird.f32 %v3607_v3  ;;  %vm1881_vm14 = vmor %vm1879_vm13, %vm1880_vm9 }
 0x5f3   : > { %v1926_v28 = vmul.f32 0.5, %v1925_v63  ;;  %v1786_v16 = vmul.f32 %v1760_v10, %v3437_v59  ;;  %v1758_v34 = vpop.xlane.xlu0 %1757  ;;  %2030 = vmatpush.xpose.msra.mxu3 %v2024_v9  ;;  %v1912_v45 = vsel %vm3648_vm5, %v3580_v58, %v1908_v27  ;;  %vm1889_vm11 = vweird.f32 %v3611_v31 }
 0x5f4   : > { %v1916_v25 = vmul.f32 0.5, %v1915_v30  ;;  %v1785_v4 = vmul.f32 %v1758_v34, %v3437_v59  ;;  %v2004_v51 = vmul.f32 %v3565_v55, %v1985_v21  ;;  %v1877_v38 = vsub.f32 1.5, %v1876_v2 }
 0x5f5   : > { %v1927_v26 = vsub.f32 1.5, %v1926_v28  ;;  %v3628_v11 = vadd.f32 1e-05, %v1786_v16  ;;  %v2496_v29 = vpop.eup %2495 }
 0x5f6   : > { %v1917_v5 = vsub.f32 1.5, %v1916_v25  ;;  %v3633_v33 = vadd.f32 1e-05, %v1785_v4  ;;  %v3636_v24 = vpop.eup %2497  ;;  %v1894_v7 = vmul.f32 %v2496_v29, %v3607_v3  ;;  %v2023_v57 = vadd.f32 %v3573_v61, %v2004_v51 }
 0x5f7   : > { %v1928_v15 = vmul.f32 %v2492_v53, %v1927_v26  ;;  %2501 = vrsqrt.f32 %v3628_v11  ;;  %v1884_v44 = vmul.f32 %v3636_v24, %v3611_v31  ;;  %v3655_v13 = vpop.eup %2499  ;;  %vm1900_vm7 = vweird.f32 %v2496_v29 }
 0x5f8   : > { %v1918_v40 = vmul.f32 %v2494_v56, %v1917_v5  ;;  %v1895_v6 = vmul.f32 %v2496_v29, %v1894_v7  ;;  %2503 = vrsqrt.f32 %v3633_v33  ;;  %2031 = vmatpush.xpose.msra.mxu3 %v2023_v57  ;;  %v1844_v12 = vmul.f32 %v3655_v13, %v3620_v41  ;;  %vm1901_vm10 = vmor %vm1899_vm6, %vm1900_vm7 }
 0x5f9   : > { %v1932_v52 = vsel %vm1931_vm1, %v2492_v53, %v1928_v15  ;;  %v1885_v14 = vmul.f32 %v3636_v24, %v1884_v44  ;;  %vm1890_vm8 = vweird.f32 %v3636_v24  ;;  %vm1869_vm0 = vweird.f32 %v3628_v11 }
 0x5fa   : > { %v1922_v42 = vsel %vm1921_vm4, %v2494_v56, %v1918_v40  ;;  %v1984_v1 = vmul.f32 %v1932_v52, %v3481_v43  ;;  %v1896_v53 = vmul.f32 0.5, %v1895_v6  ;;  %vm1891_vm12 = vmor %vm1889_vm11, %vm1890_vm8  ;;  %v1845_v26 = vmul.f32 %v3655_v13, %v1844_v12 }
 0x5fb   : > { %v1983_v32 = vmul.f32 %v1922_v42, %v3485_v54  ;;  %v1886_v22 = vmul.f32 0.5, %v1885_v14  ;;  %v1982_v54 = vmul.f32 %v1912_v45, %v3469_v49  ;;  %v1878_v49 = vmul.f32 %v3605_v0, %v1877_v38 }
 0x5fc   : > { %v2003_v60 = vmul.f32 %v3565_v55, %v1984_v1  ;;  %v1897_v46 = vsub.f32 1.5, %v1896_v53  ;;  %v1846_v27 = vmul.f32 0.5, %v1845_v26  ;;  %vm1859_vm3 = vweird.f32 %v3633_v33 }
 0x5fd   : > { %v3661_v56 = vpop.eup %2501  ;;  %v1887_v48 = vsub.f32 1.5, %v1886_v22  ;;  %v2002_v63 = vmul.f32 %v3565_v55, %v1983_v32  ;;  %v2001_v4 = vmul.f32 %v3565_v55, %v1982_v54  ;;  %v1882_v31 = vsel %vm1881_vm14, %v3605_v0, %v1878_v49 }
 0x5fe   : > { %v1864_v43 = vmul.f32 %v3661_v56, %v3628_v11  ;;  %v2022_v58 = vadd.f32 %v3573_v61, %v2003_v60  ;;  %v2504_v9 = vpop.eup %2503  ;;  %v1898_v30 = vmul.f32 %v2496_v29, %v1897_v46  ;;  %vm1870_vm15 = vweird.f32 %v3661_v56 }
 0x5ff   : > { %v1888_v28 = vmul.f32 %v3636_v24, %v1887_v48  ;;  %v1854_v16 = vmul.f32 %v2504_v9, %v3633_v33  ;;  %v2021_v25 = vadd.f32 %v3573_v61, %v2002_v63  ;;  %vm1871_vm1 = vmor %vm1869_vm0, %vm1870_vm15  ;;  %v1979_v7 = vmul.f32 %v1882_v31, %v3488_v20 }
 0x600   : > { %v1865_v10 = vmul.f32 %v3661_v56, %v1864_v43  ;;  %2032 = vmatpush.xpose.msra.mxu3 %v2022_v58  ;;  %v1902_v34 = vsel %vm1901_vm10, %v2496_v29, %v1898_v30  ;;  %v2020_v29 = vadd.f32 %v3573_v61, %v2001_v4  ;;  %v1847_v52 = vsub.f32 1.5, %v1846_v27 }
 0x601   : > { %v1855_v23 = vmul.f32 %v2504_v9, %v1854_v16  ;;  %v1981_v3 = vmul.f32 %v1902_v34, %v3500_v39  ;;  %v1892_v18 = vsel %vm1891_vm12, %v3636_v24, %v1888_v28  ;;  %vm1860_vm2 = vweird.f32 %v2504_v9 }
 0x602   : > { %v1866_v21 = vmul.f32 0.5, %v1865_v10  ;;  %v1980_v39 = vmul.f32 %v1892_v18, %v3506_v8  ;;  %vm1861_vm4 = vmor %vm1859_vm3, %vm1860_vm2  ;;  %v1998_v11 = vmul.f32 %v3565_v55, %v1979_v7  ;;  %v1848_v6 = vmul.f32 %v3655_v13, %v1847_v52 }
 0x603   : > { %v1856_v15 = vmul.f32 0.5, %v1855_v23  ;;  %v2000_v51 = vmul.f32 %v3565_v55, %v1981_v3  ;;  %vm1850_vm5 = vweird.f32 %v3655_v13  ;;  %vm1849_vm6 = vweird.f32 %v3620_v41 }
 0x604   : > { %v1867_v5 = vsub.f32 1.5, %v1866_v21  ;;  %2033 = vmatpush.xpose.msra.mxu3 %v2021_v25  ;;  %v1999_v0 = vmul.f32 %v3565_v55, %v1980_v39  ;;  %vm1851_vm7 = vmor %vm1849_vm6, %vm1850_vm5  ;;  %v2017_v37 = vadd.f32 %v3573_v61, %v1998_v11 }
 0x605   : > { %v1857_v24 = vsub.f32 1.5, %v1856_v15  ;;  %v2019_v17 = vadd.f32 %v3573_v61, %v2000_v51  ;;  %v1852_v57 = vsel %vm1851_vm7, %v3655_v13, %v1848_v6 }
 0x606   : > { %v1868_v40 = vmul.f32 %v3661_v56, %v1867_v5  ;;  %v2018_v2 = vadd.f32 %v3573_v61, %v1999_v0  ;;  %v1976_v45 = vmul.f32 %v1852_v57, %v3503_v62 }
 0x607   : > { %v1858_v8 = vmul.f32 %v2504_v9, %v1857_v24 }
 0x608   : > { %2034 = vmatpush.xpose.msra.mxu3 %v2020_v29  ;;  %v1872_v44 = vsel %vm1871_vm1, %v3661_v56, %v1868_v40  ;;  %v1995_v41 = vmul.f32 %v3565_v55, %v1976_v45 }
 0x609   : > { %v1978_v42 = vmul.f32 %v1872_v44, %v3517_v19  ;;  %v1862_v20 = vsel %vm1861_vm4, %v2504_v9, %v1858_v8 }
 0x60a   : > { %v1977_v14 = vmul.f32 %v1862_v20, %v3520_v50  ;;  %v2014_v32 = vadd.f32 %v3573_v61, %v1995_v41 }
 0x60b   : > { %v1997_v33 = vmul.f32 %v3565_v55, %v1978_v42 }
 0x60c   : > { %2035 = vmatpush.xpose.msra.mxu3 %v2019_v17  ;;  %v1996_v1 = vmul.f32 %v3565_v55, %v1977_v14  ;;  %v2027_v17 = vld [vmem:[%s3772_s6] sm:$0x1] }
 0x60d   : > { %v2016_v19 = vadd.f32 %v3573_v61, %v1997_v33 }
 0x60e   : > { %v2015_v53 = vadd.f32 %v3573_v61, %v1996_v1 }
 0x610   : > { %2036 = vmatpush.xpose.msra.mxu3 %v2018_v2 }
 0x614   : > { %2037 = vmatpush.xpose.msra.mxu3 %v2017_v37 }
 0x618   : > { %2038 = vmatpush.xpose.msra.mxu3 %v2016_v19 }
 0x61c   : > { %2039 = vmatpush.xpose.msra.mxu3 %v2015_v53 }
 0x620   : > { %2040 = vmatpush.xpose.msra.mxu3 %v2014_v32 }
 0x63c   : > { %v1750_v56 = vpop.xlane.xlu1 %1749 }
 0x63d   : > { %v1781_v50 = vmul.f32 %v1750_v56, %v3437_v59 }
 0x63f   : > { %v1797_v13 = vadd.f32 1e-05, %v1781_v50 }
 0x641   : > { %2505 = vrsqrt.f32 %v1797_v13  ;;  %vm1819_vm12 = vweird.f32 %v1797_v13 }
 0x647   : > { %v2506_v46 = vpop.eup %2505 }
 0x648   : > { %v1814_v62 = vmul.f32 %v2506_v46, %v1797_v13  ;;  %vm1820_vm11 = vweird.f32 %v2506_v46 }
 0x649   : > { %vm1821_vm14 = vmor %vm1819_vm12, %vm1820_vm11 }
 0x64a   : > { %v1815_v54 = vmul.f32 %v2506_v46, %v1814_v62 }
 0x64c   : > { %v1754_v22 = vpop.xlane.xlu2 %1753  ;;  %v1816_v30 = vmul.f32 0.5, %v1815_v54 }
 0x64d   : > { %v1783_v60 = vmul.f32 %v1754_v22, %v3437_v59 }
 0x64e   : > { %v1817_v49 = vsub.f32 1.5, %v1816_v30 }
 0x64f   : > { %v1799_v38 = vadd.f32 1e-05, %v1783_v60 }
 0x650   : > { %v1818_v4 = vmul.f32 %v2506_v46, %v1817_v49 }
 0x651   : > { %2507 = vrsqrt.f32 %v1799_v38  ;;  %vm1839_vm9 = vweird.f32 %v1799_v38 }
 0x652   : > { %v1822_v15 = vsel %vm1821_vm14, %v2506_v46, %v1818_v4 }
 0x653   : > { %v1973_v51 = vmul.f32 %v1822_v15, %v3529_v36 }
 0x654   : > { %v1752_v43 = vpop.xlane.xlu0 %1751 }
 0x655   : > { %v1782_v48 = vmul.f32 %v1752_v43, %v3437_v59  ;;  %v1992_v40 = vmul.f32 %v3565_v55, %v1973_v51 }
 0x657   : > { %v2508_v58 = vpop.eup %2507  ;;  %v1798_v63 = vadd.f32 1e-05, %v1782_v48  ;;  %v2011_v24 = vadd.f32 %v3573_v61, %v1992_v40 }
 0x658   : > { %v1834_v9 = vmul.f32 %v2508_v58, %v1799_v38  ;;  %vm1840_vm8 = vweird.f32 %v2508_v58 }
 0x659   : > { %2509 = vrsqrt.f32 %v1798_v63  ;;  %vm1841_vm10 = vmor %vm1839_vm9, %vm1840_vm8  ;;  %vm1829_vm15 = vweird.f32 %v1798_v63 }
 0x65a   : > { %v1835_v12 = vmul.f32 %v2508_v58, %v1834_v9 }
 0x65c   : > { %v1836_v10 = vmul.f32 0.5, %v1835_v12 }
 0x65e   : > { %v1837_v28 = vsub.f32 1.5, %v1836_v10 }
 0x65f   : > { %v2510_v16 = vpop.eup %2509 }
 0x660   : > { %v1838_v34 = vmul.f32 %v2508_v58, %v1837_v28  ;;  %v1824_v21 = vmul.f32 %v2510_v16, %v1798_v63  ;;  %vm1830_vm13 = vweird.f32 %v2510_v16 }
 0x661   : > { %vm1831_vm0 = vmor %vm1829_vm15, %vm1830_vm13 }
 0x662   : > { %v1842_v23 = vsel %vm1841_vm10, %v2508_v58, %v1838_v34  ;;  %v1825_v25 = vmul.f32 %v2510_v16, %v1824_v21 }
 0x663   : > { %v1975_v59 = vmul.f32 %v1842_v23, %v3541_v47 }
 0x664   : > { %v1826_v3 = vmul.f32 0.5, %v1825_v25 }
 0x665   : > { %v1994_v26 = vmul.f32 %v3565_v55, %v1975_v59 }
 0x666   : > { %v1827_v18 = vsub.f32 1.5, %v1826_v3 }
 0x667   : > { %v2013_v5 = vadd.f32 %v3573_v61, %v1994_v26 }
 0x668   : > { %v1828_v31 = vmul.f32 %v2510_v16, %v1827_v18 }
 0x669   : > { %2041 = vmatpush.xpose.msra.mxu3 %v2013_v5 }
 0x66a   : > { %v1832_v29 = vsel %vm1831_vm0, %v2510_v16, %v1828_v31 }
 0x66b   : > { %v1974_v47 = vmul.f32 %v1832_v29, %v3551_v35 }
 0x66d   : > { %v1993_v39 = vmul.f32 %v3565_v55, %v1974_v47 }
 0x66f   : > { %v2012_v27 = vadd.f32 %v3573_v61, %v1993_v39 }
 0x671   : > { %2042 = vmatpush.xpose.msra.mxu3 %v2012_v27 }
 0x675   : > { %2043 = vmatpush.xpose.msra.mxu3 %v2011_v24 }
 0x678   : > { %2044 = vmatmul.f32.vlgmr.msra.gmra.mxu3 %v2027_v17 }
 0x6fb   : > { %v2045_v36 = vpop.f32.mrf.mxu3 }
 0x6fc   : > { %2048 = vst [vmem:[%s372_s17] sm:$0x1] %v2045_v36 }
 0x6fd   : > { %2658 = shalt.err (!%p2655_p11)
}
 0x6fe   : > { %2250 = dma.vmem_to_hbm [thread:$0]  (%p2830_p5), %s2061_s20, 16, %s2063_s23, %s2050_s11  }
 0x6ff PF: > { %s2074_s15 = sand.u32 1, %s2697_s24   ;;  %p3801_p12 = scmp.ge.s32.totalorder %s2709_s27, 2 }
 0x700   : > { %s2075_s30 = scalar_lea.sflag [#allocation4], %s2074_s15 }
 0x701   : > { %p2267_p13 = pnand %p3801_p12, %p2793_p6 }
 0x703   : > { %p2268_p0 = pneg %p2267_p13 }
 0x705   : > { %2692 = dma.done.wait (%p2268_p0), %s2075_s30, 16  }
 0x706   : > { %2694 = vsyncadd (%p2268_p0), %s2075_s30, 4294967280  ;;  %s3802_s27 = sld [smem:[#allocation17_spill]]  ;;  %s3805_s24 = smov %s2701_s25 }
 0x707   : > { %s3803_s10 = sld [smem:[#allocation16_spill]] }
 0x708   : > { %s3804_s26 = sld [smem:[#allocation18_spill]] }
 0x70c   : > { %p24_p3 = scmp.ge.s32.totalorder %s3802_s27, 4  }
 0x70d   : > { %s3806_s25 = smov %s3803_s10 }
 0x70e   :  { %26 = sbr.rel (!%p24_p3) target bundleno = 12 (0xc), region = 114 }
 0x713   :  { %2080 = vsyncpa [#allocation3], 1 }
 0x714   :  { %2082 = vsyncpa [#allocation3 + $0x1], 1 }
 0x715   :  { %2083 = vsyncpa [#allocation6], 1 }
 0x716   :  { %2085 = vsyncpa [#allocation6 + $0x1], 1 }
 0x717   :  { %2086 = vsyncpa [#allocation9], 1 }
 0x718   :  { %2087 = vsyncpa [#allocation4], 1 }
 0x719   :  { %2089 = vsyncpa [#allocation4 + $0x1], 1 }

</bundles_post_ra>
